<compile_context>
chip_gen: v7x
topology: tpu7x:2x2x1
jax: 0.10.0
libtpu: 0.0.40
codegen_flags: <defaults>
</compile_context>

<pallas_src>
import functools

import jax
import jax.numpy as jnp
from jax import lax
from jax.experimental import pallas as pl
from jax.experimental.pallas import tpu as pltpu
import numpy as np


LANE = 128


def _rup(v, m=LANE):
    return ((v + m - 1) // m) * m


# ----------------------------------------------------------------------------
# Parameters: torch-layout init + one-time host-side "fusion prep"
# ----------------------------------------------------------------------------
def init_params(key, n):
    """Deterministic synthetic parameters with the lightNet(n) shapes (torch layout)."""
    ks = jax.random.split(key, 10)
    s = 0.05
    feat = 16 * (n - 6) * (n - 6)
    return {
        # conv weights stored HWIO (kh, kw, Cin, Cout); biases (Cout,)
        "conv1_w": jax.random.normal(ks[0], (3, 3, 1, 8), jnp.float32) * s,
        "conv1_b": jax.random.normal(ks[1], (8,), jnp.float32) * s,
        "conv2_w": jax.random.normal(ks[2], (3, 3, 8, 16), jnp.float32) * s,
        "conv2_b": jax.random.normal(ks[3], (16,), jnp.float32) * s,
        "conv3_w": jax.random.normal(ks[4], (3, 3, 16, 16), jnp.float32) * s,
        "conv3_b": jax.random.normal(ks[5], (16,), jnp.float32) * s,
        # fc weights stored transposed relative to torch: (in, out); fc1 rows use
        # torch's NCHW flatten order (C, H, W).
        "fc1_w": jax.random.normal(ks[6], (feat, 64), jnp.float32) * s,
        "fc1_b": jax.random.normal(ks[7], (64,), jnp.float32) * s,
        "fc2_w": jax.random.normal(ks[8], (64, 1), jnp.float32) * s,
        "fc2_b": jax.random.normal(ks[9], (1,), jnp.float32) * s,
    }


def prepare_fused_params(params, n):
    """One-time host-side weight rewrite for the fused kernel.

    * Each 3x3 VALID conv becomes 3 banded matrices W_di of shape
      (K_pad, N_pad): for activations laid out rows=H, cols=W*C (C fastest),
          out = sum_di act[di:di+Ho, :] @ W_di.
      K/N are zero-padded to the (128-aligned) lane widths of the surrounding
      activation buffers, so every store is lane-dense and zero columns/rows
      contribute exactly nothing.
    * fc1 is rewritten as W1_wide (N3_pad, Hd*64): the per-output-row weight
      blocks laid side-by-side, with torch's NCHW flatten permutation folded in.
    """
    p = {k: np.asarray(v) for k, v in params.items()}
    fused = {}
    conv_spec = [("conv1", n, 1, 8), ("conv2", n - 2, 8, 16), ("conv3", n - 4, 16, 16)]
    k_prev = n  # lane width of the kernel input x (single channel -> just W)
    for name, w_in, cin, cout in conv_spec:
        w = p[name + "_w"]                        # (3, 3, cin, cout), HWIO
        wo = w_in - 2
        k_raw, n_raw = w_in * cin, wo * cout
        k_pad, n_pad = k_prev, _rup(n_raw)
        band = np.zeros((3, k_pad, n_pad), np.float32)
        for di in range(3):
            m = np.zeros((w_in, cin, wo, cout), np.float32)
            for dj in range(3):
                for o in range(wo):
                    m[o + dj, :, o, :] = w[di, dj]
            band[di, :k_raw, :n_raw] = m.reshape(k_raw, n_raw)
        fused[name + "_wband"] = jnp.asarray(band)
        brow = np.zeros((1, n_pad), np.float32)
        brow[0, :n_raw] = np.tile(p[name + "_b"], wo)
        fused[name + "_brow"] = jnp.asarray(brow)
        k_prev = n_pad

    # fc1: fold the NCHW->(H,W,C) flatten permutation, then lay per-h blocks wide.
    hd = n - 6
    old_idx = np.arange(16 * hd * hd).reshape(16, hd, hd).transpose(1, 2, 0).reshape(-1)
    w1p = p["fc1_w"][old_idx, :]                  # (hd*hd*16, 64), rows = (h, w, c)
    n3_raw, n3_pad = hd * 16, k_prev
    w1_wide = np.zeros((n3_pad, hd * 64), np.float32)
    for h in range(hd):
        w1_wide[:n3_raw, h * 64:(h + 1) * 64] = w1p[h * n3_raw:(h + 1) * n3_raw, :]
    fused["fc1_wide"] = jnp.asarray(w1_wide)
    fused["fc1_brow"] = jnp.asarray(p["fc1_b"][None, :])     # (1, 64)
    fused["fc2_wrow"] = jnp.asarray(p["fc2_w"].T)            # (1, 64)
    fused["fc2_b"] = jnp.asarray(p["fc2_b"].reshape(1, 1))   # (1, 1) scalar (SMEM)
    return fused


# ----------------------------------------------------------------------------
# Fused forward: one pallas_call, batch-tiled grid
# ----------------------------------------------------------------------------
@functools.partial(jax.jit, static_argnums=(2, 3))
def lightnet_forward(x_nchw, fused, n, tb=None):
    """x_nchw: (B, 1, n, n) float32 -> (B, 1) float32 (matches PyTorch lightNet)."""
    B = x_nchw.shape[0]
    if tb is None:                       # images per grid step
        tb = B if (B <= 8 or B % 8 != 0) else 8
    assert B % tb == 0
    Hd = n - 6
    # C == 1, so NCHW -> batch-stacked 2-D rows is a pure reshape (no transpose).
    x_stack = x_nchw.reshape(B * n, n)

    # Lane widths (padded, from the prepared weights) and per-step row geometry.
    N1p = fused["conv1_wband"].shape[2]
    N2p = fused["conv2_wband"].shape[2]
    N3p = fused["conv3_wband"].shape[2]
    F1N = fused["fc1_wide"].shape[1]     # Hd * 64, already a 128-multiple
    Rws = tb * n                         # rows per grid step (8-aligned for n=16)
    R1, R2, R3 = Rws - 2, Rws - 4, Rws - 6

    def kernel(x_ref, cw1_ref, cb1_ref, cw2_ref, cb2_ref, cw3_ref, cb3_ref,
               w1_ref, b1_ref, w2_ref, b2_ref, o_ref,
               a1_ref, a2_ref, a3_ref, hid_ref):
        # ---- conv1 + bias + ReLU : 3 shifted matmuls, chained f32 accumulator ----
        acc = jnp.dot(x_ref[0:R1, :], cw1_ref[0], preferred_element_type=jnp.float32)
        acc = acc + jnp.dot(x_ref[1:1 + R1, :], cw1_ref[1],
                            preferred_element_type=jnp.float32)
        acc = acc + jnp.dot(x_ref[2:2 + R1, :], cw1_ref[2],
                            preferred_element_type=jnp.float32)
        a1_ref[0:R1, :] = jnp.maximum(acc + cb1_ref[...], 0.0)

        # ---- conv2 + bias + ReLU ----
        acc = jnp.dot(a1_ref[0:R2, :], cw2_ref[0], preferred_element_type=jnp.float32)
        acc = acc + jnp.dot(a1_ref[1:1 + R2, :], cw2_ref[1],
                            preferred_element_type=jnp.float32)
        acc = acc + jnp.dot(a1_ref[2:2 + R2, :], cw2_ref[2],
                            preferred_element_type=jnp.float32)
        a2_ref[0:R2, :] = jnp.maximum(acc + cb2_ref[...], 0.0)

        # ---- conv3 + bias + ReLU ----
        acc = jnp.dot(a2_ref[0:R3, :], cw3_ref[0], preferred_element_type=jnp.float32)
        acc = acc + jnp.dot(a2_ref[1:1 + R3, :], cw3_ref[1],
                            preferred_element_type=jnp.float32)
        acc = acc + jnp.dot(a2_ref[2:2 + R3, :], cw3_ref[2],
                            preferred_element_type=jnp.float32)
        a3_ref[0:R3, :] = jnp.maximum(acc + cb3_ref[...], 0.0)
        # Zero the never-computed tail rows so the full-buffer fc1 matmul below is
        # 8-aligned in M and reads only defined data (tail partials are discarded).
        a3_ref[R3:Rws, :] = jnp.zeros((Rws - R3, N3p), jnp.float32)

        # ---- fc1: ONE wide MXU matmul for all rows/images (RHS pushed once) ----
        # partial[r, h*64:(h+1)*64] = a3[r, :] @ W1_h ; lane-dense output (Hd*64).
        partial = jnp.dot(a3_ref[...], w1_ref[...], preferred_element_type=jnp.float32)
        # Per-image hidden vector = sum of the Hd diagonal (1,64) blocks (VPU adds).
        for b in range(tb):
            s = partial[b * n:b * n + 1, 0:64]
            for h in range(1, Hd):
                s = s + partial[b * n + h:b * n + h + 1, h * 64:(h + 1) * 64]
            hid_ref[b:b + 1, :] = s

        # ---- fc1 bias/ReLU + fc2 head, fully batched, single store ----
        hid = jnp.maximum(hid_ref[...] + b1_ref[...], 0.0)        # (tb, 64)
        out = jnp.sum(hid * w2_ref[...], axis=1, keepdims=True) + b2_ref[0, 0]
        o_ref[...] = out

    # Weights use constant block indices -> fetched once, VMEM-resident across steps.
    wspec2 = lambda shape: pl.BlockSpec(shape, lambda i: (0, 0))
    wspec3 = lambda shape: pl.BlockSpec(shape, lambda i: (0, 0, 0))

    return pl.pallas_call(
        kernel,
        out_shape=jax.ShapeDtypeStruct((B, 1), jnp.float32),
        grid=(B // tb,),
        in_specs=[
            pl.BlockSpec((Rws, n), lambda i: (i, 0)),     # per-step stacked image rows
            wspec3((3, n, N1p)), wspec2((1, N1p)),        # conv1 band + bias row
            wspec3((3, N1p, N2p)), wspec2((1, N2p)),      # conv2
            wspec3((3, N2p, N3p)), wspec2((1, N3p)),      # conv3
            wspec2((N3p, F1N)),                           # fc1 wide (flatten folded in)
            wspec2((1, 64)),                              # fc1 bias row
            wspec2((1, 64)),                              # fc2 weight row
            pl.BlockSpec(memory_space=pltpu.MemorySpace.SMEM),  # fc2 bias scalar
        ],
        out_specs=pl.BlockSpec((tb, 1), lambda i: (i, 0)),
        scratch_shapes=[
            pltpu.VMEM((Rws, N1p), jnp.float32),          # conv1 activation (lane-dense)
            pltpu.VMEM((Rws, N2p), jnp.float32),          # conv2 activation
            pltpu.VMEM((Rws, N3p), jnp.float32),          # conv3 activation
            pltpu.VMEM((tb, 64), jnp.float32),            # fc1 hidden rows
        ],
        # Independent batch tiles -> "parallel" so v7x can shard steps across both TCs.
        # VMEM footprint here is ~4 MB (weights double-buffer + scratch); re-derive and
        # set vmem_limit_bytes explicitly when scaling n / tb up (esp. v7x 64 MiB).
        compiler_params=pltpu.CompilerParams(dimension_semantics=("parallel",)),
    )(x_stack,
      fused["conv1_wband"], fused["conv1_brow"],
      fused["conv2_wband"], fused["conv2_brow"],
      fused["conv3_wband"], fused["conv3_brow"],
      fused["fc1_wide"], fused["fc1_brow"],
      fused["fc2_wrow"], fused["fc2_b"])


# ----------------------------------------------------------------------------
# Pure-JAX reference (no Pallas), built from the torch-layout params
# ----------------------------------------------------------------------------
def lightnet_reference(x_nchw, params, n):
    x = jnp.transpose(x_nchw, (0, 2, 3, 1))
    for w_name, b_name in (("conv1_w", "conv1_b"),
                           ("conv2_w", "conv2_b"),
                           ("conv3_w", "conv3_b")):
        x = lax.conv_general_dilated(
            x, params[w_name], (1, 1), "VALID",
            dimension_numbers=("NHWC", "HWIO", "NHWC"))
        x = jax.nn.relu(x + params[b_name])
    B = x.shape[0]
    feat = jnp.transpose(x, (0, 3, 1, 2)).reshape(B, 16 * (n - 6) * (n - 6))
    h = jax.nn.relu(feat @ params["fc1_w"] + params["fc1_b"])
    return h @ params["fc2_w"] + params["fc2_b"]


# ----------------------------------------------------------------------------
if __name__ == "__main__":
    n = 16          # spatial size (input is n x n, single channel)
    batch = 2

    key = jax.random.PRNGKey(0)
    k_x, k_p = jax.random.split(key)
    x = jax.random.normal(k_x, (batch, 1, n, n), jnp.float32)
    params = init_params(k_p, n)
    fused = prepare_fused_params(params, n)     # one-time weight rewrite

    out = jax.block_until_ready(lightnet_forward(x, fused, n))
    ref = jax.block_until_ready(lightnet_reference(x, params, n))

    assert out.shape == (batch, 1), out.shape
    np.testing.assert_allclose(np.asarray(out), np.asarray(ref), rtol=1e-4, atol=1e-4)

    print("KERNEL_OK")
</pallas_src>

<mosaic_0001>
module attributes {stable_mosaic.version = 11 : i64} {
  func.func @kernel(%arg0: i32, %arg1: memref<32x16xf32, #tpu.memory_space<vmem>>, %arg2: memref<3x16x128xf32, #tpu.memory_space<vmem>>, %arg3: memref<1x128xf32, #tpu.memory_space<vmem>>, %arg4: memref<3x128x256xf32, #tpu.memory_space<vmem>>, %arg5: memref<1x256xf32, #tpu.memory_space<vmem>>, %arg6: memref<3x256x256xf32, #tpu.memory_space<vmem>>, %arg7: memref<1x256xf32, #tpu.memory_space<vmem>>, %arg8: memref<256x640xf32, #tpu.memory_space<vmem>>, %arg9: memref<1x64xf32, #tpu.memory_space<vmem>>, %arg10: memref<1x64xf32, #tpu.memory_space<vmem>>, %arg11: memref<1x1xf32, #tpu.memory_space<smem>>, %arg12: memref<2x1xf32, #tpu.memory_space<vmem>>, %arg13: memref<32x128xf32, #tpu.memory_space<vmem>>, %arg14: memref<32x256xf32, #tpu.memory_space<vmem>>, %arg15: memref<32x256xf32, #tpu.memory_space<vmem>>, %arg16: memref<2x64xf32, #tpu.memory_space<vmem>>) attributes {dimension_semantics = [#tpu.dimension_semantics<parallel>], iteration_bounds = array<i64: 1>, scalar_prefetch = 0 : i64, scratch_operands = 4 : i64, tpu.core_type = #tpu.core_type<tc>, window_params = [{transform_indices = @transform_0, window_bounds = array<i64: 32, 16>}, {pipeline_mode = #tpu.pipeline_mode<synchronous>, transform_indices = @transform_1, window_bounds = array<i64: 3, 16, 128>}, {pipeline_mode = #tpu.pipeline_mode<synchronous>, transform_indices = @transform_2, window_bounds = array<i64: 1, 128>}, {pipeline_mode = #tpu.pipeline_mode<synchronous>, transform_indices = @transform_3, window_bounds = array<i64: 3, 128, 256>}, {pipeline_mode = #tpu.pipeline_mode<synchronous>, transform_indices = @transform_4, window_bounds = array<i64: 1, 256>}, {pipeline_mode = #tpu.pipeline_mode<synchronous>, transform_indices = @transform_5, window_bounds = array<i64: 3, 256, 256>}, {pipeline_mode = #tpu.pipeline_mode<synchronous>, transform_indices = @transform_6, window_bounds = array<i64: 1, 256>}, {pipeline_mode = #tpu.pipeline_mode<synchronous>, transform_indices = @transform_7, window_bounds = array<i64: 256, 640>}, {pipeline_mode = #tpu.pipeline_mode<synchronous>, transform_indices = @transform_8, window_bounds = array<i64: 1, 64>}, {pipeline_mode = #tpu.pipeline_mode<synchronous>, transform_indices = @transform_9, window_bounds = array<i64: 1, 64>}, {transform_indices = @transform_10, window_bounds = array<i64: 1, 1>}, {transform_indices = @transform_11, window_bounds = array<i64: 2, 1>}]} {
    %c0 = arith.constant 0 : index
    %c0_0 = arith.constant 0 : index
    %0 = vector.load %arg1[%c0, %c0_0] : memref<32x16xf32, #tpu.memory_space<vmem>>, vector<30x16xf32>
    %c0_1 = arith.constant 0 : index
    %c0_2 = arith.constant 0 : index
    %c0_3 = arith.constant 0 : index
    %1 = vector.load %arg2[%c0_1, %c0_2, %c0_3] : memref<3x16x128xf32, #tpu.memory_space<vmem>>, vector<1x16x128xf32>
    %2 = vector.shape_cast %1 : vector<1x16x128xf32> to vector<16x128xf32>
    %cst = arith.constant dense<0.000000e+00> : vector<30x128xf32>
    %3 = tpu.matmul %0, %2, %cst {dimension_numbers = #tpu.dot_dimension_numbers<[1], [0], [0], [1], [0, 0, 1, 1], [], []>} : vector<30x16xf32>, vector<16x128xf32>, vector<30x128xf32> -> vector<30x128xf32>
    %c1 = arith.constant 1 : index
    %c0_4 = arith.constant 0 : index
    %4 = vector.load %arg1[%c1, %c0_4] : memref<32x16xf32, #tpu.memory_space<vmem>>, vector<30x16xf32>
    %c1_5 = arith.constant 1 : index
    %c0_6 = arith.constant 0 : index
    %c0_7 = arith.constant 0 : index
    %5 = vector.load %arg2[%c1_5, %c0_6, %c0_7] : memref<3x16x128xf32, #tpu.memory_space<vmem>>, vector<1x16x128xf32>
    %6 = vector.shape_cast %5 : vector<1x16x128xf32> to vector<16x128xf32>
    %cst_8 = arith.constant dense<0.000000e+00> : vector<30x128xf32>
    %7 = tpu.matmul %4, %6, %cst_8 {dimension_numbers = #tpu.dot_dimension_numbers<[1], [0], [0], [1], [0, 0, 1, 1], [], []>} : vector<30x16xf32>, vector<16x128xf32>, vector<30x128xf32> -> vector<30x128xf32>
    %8 = arith.addf %3, %7 : vector<30x128xf32>
    %c2 = arith.constant 2 : index
    %c0_9 = arith.constant 0 : index
    %9 = vector.load %arg1[%c2, %c0_9] : memref<32x16xf32, #tpu.memory_space<vmem>>, vector<30x16xf32>
    %c2_10 = arith.constant 2 : index
    %c0_11 = arith.constant 0 : index
    %c0_12 = arith.constant 0 : index
    %10 = vector.load %arg2[%c2_10, %c0_11, %c0_12] : memref<3x16x128xf32, #tpu.memory_space<vmem>>, vector<1x16x128xf32>
    %11 = vector.shape_cast %10 : vector<1x16x128xf32> to vector<16x128xf32>
    %cst_13 = arith.constant dense<0.000000e+00> : vector<30x128xf32>
    %12 = tpu.matmul %9, %11, %cst_13 {dimension_numbers = #tpu.dot_dimension_numbers<[1], [0], [0], [1], [0, 0, 1, 1], [], []>} : vector<30x16xf32>, vector<16x128xf32>, vector<30x128xf32> -> vector<30x128xf32>
    %13 = arith.addf %8, %12 : vector<30x128xf32>
    %c0_14 = arith.constant 0 : index
    %c0_15 = arith.constant 0 : index
    %14 = vector.load %arg3[%c0_14, %c0_15] : memref<1x128xf32, #tpu.memory_space<vmem>>, vector<1x128xf32>
    %15 = vector.broadcast %14 : vector<1x128xf32> to vector<30x128xf32>
    %16 = arith.addf %13, %15 : vector<30x128xf32>
    %cst_16 = arith.constant 0.000000e+00 : f32
    %17 = vector.broadcast %cst_16 : f32 to vector<30x128xf32>
    %18 = arith.maximumf %16, %17 : vector<30x128xf32>
    %c0_17 = arith.constant 0 : index
    %c0_18 = arith.constant 0 : index
    %19 = vector.load %arg13[%c0_17, %c0_18] : memref<32x128xf32, #tpu.memory_space<vmem>>, vector<30x128xf32>
    tpu.vector_store %arg13[%c0_17, %c0_18], %18 {strides = array<i32>} : memref<32x128xf32, #tpu.memory_space<vmem>>, vector<30x128xf32>,
    %c0_19 = arith.constant 0 : index
    %c0_20 = arith.constant 0 : index
    %20 = vector.load %arg13[%c0_19, %c0_20] : memref<32x128xf32, #tpu.memory_space<vmem>>, vector<28x128xf32>
    %c0_21 = arith.constant 0 : index
    %c0_22 = arith.constant 0 : index
    %c0_23 = arith.constant 0 : index
    %21 = vector.load %arg4[%c0_21, %c0_22, %c0_23] : memref<3x128x256xf32, #tpu.memory_space<vmem>>, vector<1x128x256xf32>
    %22 = vector.shape_cast %21 : vector<1x128x256xf32> to vector<128x256xf32>
    %cst_24 = arith.constant dense<0.000000e+00> : vector<28x256xf32>
    %23 = tpu.matmul %20, %22, %cst_24 {dimension_numbers = #tpu.dot_dimension_numbers<[1], [0], [0], [1], [0, 0, 1, 1], [], []>} : vector<28x128xf32>, vector<128x256xf32>, vector<28x256xf32> -> vector<28x256xf32>
    %c1_25 = arith.constant 1 : index
    %c0_26 = arith.constant 0 : index
    %24 = vector.load %arg13[%c1_25, %c0_26] : memref<32x128xf32, #tpu.memory_space<vmem>>, vector<28x128xf32>
    %c1_27 = arith.constant 1 : index
    %c0_28 = arith.constant 0 : index
    %c0_29 = arith.constant 0 : index
    %25 = vector.load %arg4[%c1_27, %c0_28, %c0_29] : memref<3x128x256xf32, #tpu.memory_space<vmem>>, vector<1x128x256xf32>
    %26 = vector.shape_cast %25 : vector<1x128x256xf32> to vector<128x256xf32>
    %cst_30 = arith.constant dense<0.000000e+00> : vector<28x256xf32>
    %27 = tpu.matmul %24, %26, %cst_30 {dimension_numbers = #tpu.dot_dimension_numbers<[1], [0], [0], [1], [0, 0, 1, 1], [], []>} : vector<28x128xf32>, vector<128x256xf32>, vector<28x256xf32> -> vector<28x256xf32>
    %28 = arith.addf %23, %27 : vector<28x256xf32>
    %c2_31 = arith.constant 2 : index
    %c0_32 = arith.constant 0 : index
    %29 = vector.load %arg13[%c2_31, %c0_32] : memref<32x128xf32, #tpu.memory_space<vmem>>, vector<28x128xf32>
    %c2_33 = arith.constant 2 : index
    %c0_34 = arith.constant 0 : index
    %c0_35 = arith.constant 0 : index
    %30 = vector.load %arg4[%c2_33, %c0_34, %c0_35] : memref<3x128x256xf32, #tpu.memory_space<vmem>>, vector<1x128x256xf32>
    %31 = vector.shape_cast %30 : vector<1x128x256xf32> to vector<128x256xf32>
    %cst_36 = arith.constant dense<0.000000e+00> : vector<28x256xf32>
    %32 = tpu.matmul %29, %31, %cst_36 {dimension_numbers = #tpu.dot_dimension_numbers<[1], [0], [0], [1], [0, 0, 1, 1], [], []>} : vector<28x128xf32>, vector<128x256xf32>, vector<28x256xf32> -> vector<28x256xf32>
    %33 = arith.addf %28, %32 : vector<28x256xf32>
    %c0_37 = arith.constant 0 : index
    %c0_38 = arith.constant 0 : index
    %34 = vector.load %arg5[%c0_37, %c0_38] : memref<1x256xf32, #tpu.memory_space<vmem>>, vector<1x256xf32>
    %35 = vector.broadcast %34 : vector<1x256xf32> to vector<28x256xf32>
    %36 = arith.addf %33, %35 : vector<28x256xf32>
    %cst_39 = arith.constant 0.000000e+00 : f32
    %37 = vector.broadcast %cst_39 : f32 to vector<28x256xf32>
    %38 = arith.maximumf %36, %37 : vector<28x256xf32>
    %c0_40 = arith.constant 0 : index
    %c0_41 = arith.constant 0 : index
    %39 = vector.load %arg14[%c0_40, %c0_41] : memref<32x256xf32, #tpu.memory_space<vmem>>, vector<28x256xf32>
    tpu.vector_store %arg14[%c0_40, %c0_41], %38 {strides = array<i32>} : memref<32x256xf32, #tpu.memory_space<vmem>>, vector<28x256xf32>,
    %c0_42 = arith.constant 0 : index
    %c0_43 = arith.constant 0 : index
    %40 = vector.load %arg14[%c0_42, %c0_43] : memref<32x256xf32, #tpu.memory_space<vmem>>, vector<26x256xf32>
    %c0_44 = arith.constant 0 : index
    %c0_45 = arith.constant 0 : index
    %c0_46 = arith.constant 0 : index
    %41 = vector.load %arg6[%c0_44, %c0_45, %c0_46] : memref<3x256x256xf32, #tpu.memory_space<vmem>>, vector<1x256x256xf32>
    %42 = vector.shape_cast %41 : vector<1x256x256xf32> to vector<256x256xf32>
    %cst_47 = arith.constant dense<0.000000e+00> : vector<26x256xf32>
    %43 = tpu.matmul %40, %42, %cst_47 {dimension_numbers = #tpu.dot_dimension_numbers<[1], [0], [0], [1], [0, 0, 1, 1], [], []>} : vector<26x256xf32>, vector<256x256xf32>, vector<26x256xf32> -> vector<26x256xf32>
    %c1_48 = arith.constant 1 : index
    %c0_49 = arith.constant 0 : index
    %44 = vector.load %arg14[%c1_48, %c0_49] : memref<32x256xf32, #tpu.memory_space<vmem>>, vector<26x256xf32>
    %c1_50 = arith.constant 1 : index
    %c0_51 = arith.constant 0 : index
    %c0_52 = arith.constant 0 : index
    %45 = vector.load %arg6[%c1_50, %c0_51, %c0_52] : memref<3x256x256xf32, #tpu.memory_space<vmem>>, vector<1x256x256xf32>
    %46 = vector.shape_cast %45 : vector<1x256x256xf32> to vector<256x256xf32>
    %cst_53 = arith.constant dense<0.000000e+00> : vector<26x256xf32>
    %47 = tpu.matmul %44, %46, %cst_53 {dimension_numbers = #tpu.dot_dimension_numbers<[1], [0], [0], [1], [0, 0, 1, 1], [], []>} : vector<26x256xf32>, vector<256x256xf32>, vector<26x256xf32> -> vector<26x256xf32>
    %48 = arith.addf %43, %47 : vector<26x256xf32>
    %c2_54 = arith.constant 2 : index
    %c0_55 = arith.constant 0 : index
    %49 = vector.load %arg14[%c2_54, %c0_55] : memref<32x256xf32, #tpu.memory_space<vmem>>, vector<26x256xf32>
    %c2_56 = arith.constant 2 : index
    %c0_57 = arith.constant 0 : index
    %c0_58 = arith.constant 0 : index
    %50 = vector.load %arg6[%c2_56, %c0_57, %c0_58] : memref<3x256x256xf32, #tpu.memory_space<vmem>>, vector<1x256x256xf32>
    %51 = vector.shape_cast %50 : vector<1x256x256xf32> to vector<256x256xf32>
    %cst_59 = arith.constant dense<0.000000e+00> : vector<26x256xf32>
    %52 = tpu.matmul %49, %51, %cst_59 {dimension_numbers = #tpu.dot_dimension_numbers<[1], [0], [0], [1], [0, 0, 1, 1], [], []>} : vector<26x256xf32>, vector<256x256xf32>, vector<26x256xf32> -> vector<26x256xf32>
    %53 = arith.addf %48, %52 : vector<26x256xf32>
    %c0_60 = arith.constant 0 : index
    %c0_61 = arith.constant 0 : index
    %54 = vector.load %arg7[%c0_60, %c0_61] : memref<1x256xf32, #tpu.memory_space<vmem>>, vector<1x256xf32>
    %55 = vector.broadcast %54 : vector<1x256xf32> to vector<26x256xf32>
    %56 = arith.addf %53, %55 : vector<26x256xf32>
    %cst_62 = arith.constant 0.000000e+00 : f32
    %57 = vector.broadcast %cst_62 : f32 to vector<26x256xf32>
    %58 = arith.maximumf %56, %57 : vector<26x256xf32>
    %c0_63 = arith.constant 0 : index
    %c0_64 = arith.constant 0 : index
    %59 = vector.load %arg15[%c0_63, %c0_64] : memref<32x256xf32, #tpu.memory_space<vmem>>, vector<26x256xf32>
    tpu.vector_store %arg15[%c0_63, %c0_64], %58 {strides = array<i32>} : memref<32x256xf32, #tpu.memory_space<vmem>>, vector<26x256xf32>,
    %cst_65 = arith.constant 0.000000e+00 : f32
    %60 = vector.broadcast %cst_65 : f32 to vector<6x256xf32>
    %c26 = arith.constant 26 : index
    %c0_66 = arith.constant 0 : index
    %61 = vector.load %arg15[%c26, %c0_66] : memref<32x256xf32, #tpu.memory_space<vmem>>, vector<6x256xf32>
    tpu.vector_store %arg15[%c26, %c0_66], %60 {strides = array<i32>} : memref<32x256xf32, #tpu.memory_space<vmem>>, vector<6x256xf32>,
    %c0_67 = arith.constant 0 : index
    %c0_68 = arith.constant 0 : index
    %62 = vector.load %arg15[%c0_67, %c0_68] : memref<32x256xf32, #tpu.memory_space<vmem>>, vector<32x256xf32>
    %c0_69 = arith.constant 0 : index
    %c0_70 = arith.constant 0 : index
    %63 = vector.load %arg8[%c0_69, %c0_70] : memref<256x640xf32, #tpu.memory_space<vmem>>, vector<256x640xf32>
    %cst_71 = arith.constant dense<0.000000e+00> : vector<32x640xf32>
    %64 = tpu.matmul %62, %63, %cst_71 {dimension_numbers = #tpu.dot_dimension_numbers<[1], [0], [0], [1], [0, 0, 1, 1], [], []>} : vector<32x256xf32>, vector<256x640xf32>, vector<32x640xf32> -> vector<32x640xf32>
    %65 = vector.extract_strided_slice %64 {offsets = [0, 0], sizes = [1, 64], strides = [1, 1]} : vector<32x640xf32> to vector<1x64xf32>
    %66 = vector.extract_strided_slice %64 {offsets = [1, 64], sizes = [1, 64], strides = [1, 1]} : vector<32x640xf32> to vector<1x64xf32>
    %67 = arith.addf %65, %66 : vector<1x64xf32>
    %68 = vector.extract_strided_slice %64 {offsets = [2, 128], sizes = [1, 64], strides = [1, 1]} : vector<32x640xf32> to vector<1x64xf32>
    %69 = arith.addf %67, %68 : vector<1x64xf32>
    %70 = vector.extract_strided_slice %64 {offsets = [3, 192], sizes = [1, 64], strides = [1, 1]} : vector<32x640xf32> to vector<1x64xf32>
    %71 = arith.addf %69, %70 : vector<1x64xf32>
    %72 = vector.extract_strided_slice %64 {offsets = [4, 256], sizes = [1, 64], strides = [1, 1]} : vector<32x640xf32> to vector<1x64xf32>
    %73 = arith.addf %71, %72 : vector<1x64xf32>
    %74 = vector.extract_strided_slice %64 {offsets = [5, 320], sizes = [1, 64], strides = [1, 1]} : vector<32x640xf32> to vector<1x64xf32>
    %75 = arith.addf %73, %74 : vector<1x64xf32>
    %76 = vector.extract_strided_slice %64 {offsets = [6, 384], sizes = [1, 64], strides = [1, 1]} : vector<32x640xf32> to vector<1x64xf32>
    %77 = arith.addf %75, %76 : vector<1x64xf32>
    %78 = vector.extract_strided_slice %64 {offsets = [7, 448], sizes = [1, 64], strides = [1, 1]} : vector<32x640xf32> to vector<1x64xf32>
    %79 = arith.addf %77, %78 : vector<1x64xf32>
    %80 = vector.extract_strided_slice %64 {offsets = [8, 512], sizes = [1, 64], strides = [1, 1]} : vector<32x640xf32> to vector<1x64xf32>
    %81 = arith.addf %79, %80 : vector<1x64xf32>
    %82 = vector.extract_strided_slice %64 {offsets = [9, 576], sizes = [1, 64], strides = [1, 1]} : vector<32x640xf32> to vector<1x64xf32>
    %83 = arith.addf %81, %82 : vector<1x64xf32>
    %c0_72 = arith.constant 0 : index
    %c0_73 = arith.constant 0 : index
    %84 = vector.load %arg16[%c0_72, %c0_73] : memref<2x64xf32, #tpu.memory_space<vmem>>, vector<1x64xf32>
    tpu.vector_store %arg16[%c0_72, %c0_73], %83 {strides = array<i32>} : memref<2x64xf32, #tpu.memory_space<vmem>>, vector<1x64xf32>,
    %85 = vector.extract_strided_slice %64 {offsets = [16, 0], sizes = [1, 64], strides = [1, 1]} : vector<32x640xf32> to vector<1x64xf32>
    %86 = vector.extract_strided_slice %64 {offsets = [17, 64], sizes = [1, 64], strides = [1, 1]} : vector<32x640xf32> to vector<1x64xf32>
    %87 = arith.addf %85, %86 : vector<1x64xf32>
    %88 = vector.extract_strided_slice %64 {offsets = [18, 128], sizes = [1, 64], strides = [1, 1]} : vector<32x640xf32> to vector<1x64xf32>
    %89 = arith.addf %87, %88 : vector<1x64xf32>
    %90 = vector.extract_strided_slice %64 {offsets = [19, 192], sizes = [1, 64], strides = [1, 1]} : vector<32x640xf32> to vector<1x64xf32>
    %91 = arith.addf %89, %90 : vector<1x64xf32>
    %92 = vector.extract_strided_slice %64 {offsets = [20, 256], sizes = [1, 64], strides = [1, 1]} : vector<32x640xf32> to vector<1x64xf32>
    %93 = arith.addf %91, %92 : vector<1x64xf32>
    %94 = vector.extract_strided_slice %64 {offsets = [21, 320], sizes = [1, 64], strides = [1, 1]} : vector<32x640xf32> to vector<1x64xf32>
    %95 = arith.addf %93, %94 : vector<1x64xf32>
    %96 = vector.extract_strided_slice %64 {offsets = [22, 384], sizes = [1, 64], strides = [1, 1]} : vector<32x640xf32> to vector<1x64xf32>
    %97 = arith.addf %95, %96 : vector<1x64xf32>
    %98 = vector.extract_strided_slice %64 {offsets = [23, 448], sizes = [1, 64], strides = [1, 1]} : vector<32x640xf32> to vector<1x64xf32>
    %99 = arith.addf %97, %98 : vector<1x64xf32>
    %100 = vector.extract_strided_slice %64 {offsets = [24, 512], sizes = [1, 64], strides = [1, 1]} : vector<32x640xf32> to vector<1x64xf32>
    %101 = arith.addf %99, %100 : vector<1x64xf32>
    %102 = vector.extract_strided_slice %64 {offsets = [25, 576], sizes = [1, 64], strides = [1, 1]} : vector<32x640xf32> to vector<1x64xf32>
    %103 = arith.addf %101, %102 : vector<1x64xf32>
    %c1_74 = arith.constant 1 : index
    %c0_75 = arith.constant 0 : index
    %104 = vector.load %arg16[%c1_74, %c0_75] : memref<2x64xf32, #tpu.memory_space<vmem>>, vector<1x64xf32>
    tpu.vector_store %arg16[%c1_74, %c0_75], %103 {strides = array<i32>} : memref<2x64xf32, #tpu.memory_space<vmem>>, vector<1x64xf32>,
    %c0_76 = arith.constant 0 : index
    %c0_77 = arith.constant 0 : index
    %105 = vector.load %arg16[%c0_76, %c0_77] : memref<2x64xf32, #tpu.memory_space<vmem>>, vector<2x64xf32>
    %c0_78 = arith.constant 0 : index
    %c0_79 = arith.constant 0 : index
    %106 = vector.load %arg9[%c0_78, %c0_79] : memref<1x64xf32, #tpu.memory_space<vmem>>, vector<1x64xf32>
    %107 = vector.broadcast %106 : vector<1x64xf32> to vector<2x64xf32>
    %108 = arith.addf %105, %107 : vector<2x64xf32>
    %cst_80 = arith.constant 0.000000e+00 : f32
    %109 = vector.broadcast %cst_80 : f32 to vector<2x64xf32>
    %110 = arith.maximumf %108, %109 : vector<2x64xf32>
    %c0_81 = arith.constant 0 : index
    %c0_82 = arith.constant 0 : index
    %111 = vector.load %arg10[%c0_81, %c0_82] : memref<1x64xf32, #tpu.memory_space<vmem>>, vector<1x64xf32>
    %112 = vector.broadcast %111 : vector<1x64xf32> to vector<2x64xf32>
    %113 = arith.mulf %110, %112 : vector<2x64xf32>
    %cst_83 = arith.constant dense<0.000000e+00> : vector<2xf32>
    %114 = vector.multi_reduction <add>, %113, %cst_83 [1] : vector<2x64xf32> to vector<2xf32>
    %115 = vector.shape_cast %114 : vector<2xf32> to vector<2x1xf32>
    %c0_84 = arith.constant 0 : index
    %c0_85 = arith.constant 0 : index
    %116 = memref.load %arg11[%c0_84, %c0_85] : memref<1x1xf32, #tpu.memory_space<smem>>
    %117 = vector.broadcast %116 : f32 to vector<2x1xf32>
    %118 = arith.addf %115, %117 : vector<2x1xf32>
    %c0_86 = arith.constant 0 : index
    %c0_87 = arith.constant 0 : index
    %119 = vector.load %arg12[%c0_86, %c0_87] : memref<2x1xf32, #tpu.memory_space<vmem>>, vector<2x1xf32>
    tpu.vector_store %arg12[%c0_86, %c0_87], %118 {strides = array<i32>} : memref<2x1xf32, #tpu.memory_space<vmem>>, vector<2x1xf32>,
    return
  }
  func.func @transform_0(%arg0: i32) -> (i32, i32) {
    %c0_i32 = arith.constant 0 : i32
    %c0_i32_0 = arith.constant 0 : i32
    return %arg0, %c0_i32 : i32, i32
  }
  func.func @transform_1(%arg0: i32) -> (i32, i32, i32) {
    %c0_i32 = arith.constant 0 : i32
    %c0_i32_0 = arith.constant 0 : i32
    %c0_i32_1 = arith.constant 0 : i32
    %c0_i32_2 = arith.constant 0 : i32
    return %c0_i32, %c0_i32_0, %c0_i32_1 : i32, i32, i32
  }
  func.func @transform_2(%arg0: i32) -> (i32, i32) {
    %c0_i32 = arith.constant 0 : i32
    %c0_i32_0 = arith.constant 0 : i32
    %c0_i32_1 = arith.constant 0 : i32
    return %c0_i32, %c0_i32_0 : i32, i32
  }
  func.func @transform_3(%arg0: i32) -> (i32, i32, i32) {
    %c0_i32 = arith.constant 0 : i32
    %c0_i32_0 = arith.constant 0 : i32
    %c0_i32_1 = arith.constant 0 : i32
    %c0_i32_2 = arith.constant 0 : i32
    return %c0_i32, %c0_i32_0, %c0_i32_1 : i32, i32, i32
  }
  func.func @transform_4(%arg0: i32) -> (i32, i32) {
    %c0_i32 = arith.constant 0 : i32
    %c0_i32_0 = arith.constant 0 : i32
    %c0_i32_1 = arith.constant 0 : i32
    return %c0_i32, %c0_i32_0 : i32, i32
  }
  func.func @transform_5(%arg0: i32) -> (i32, i32, i32) {
    %c0_i32 = arith.constant 0 : i32
    %c0_i32_0 = arith.constant 0 : i32
    %c0_i32_1 = arith.constant 0 : i32
    %c0_i32_2 = arith.constant 0 : i32
    return %c0_i32, %c0_i32_0, %c0_i32_1 : i32, i32, i32
  }
  func.func @transform_6(%arg0: i32) -> (i32, i32) {
    %c0_i32 = arith.constant 0 : i32
    %c0_i32_0 = arith.constant 0 : i32
    %c0_i32_1 = arith.constant 0 : i32
    return %c0_i32, %c0_i32_0 : i32, i32
  }
  func.func @transform_7(%arg0: i32) -> (i32, i32) {
    %c0_i32 = arith.constant 0 : i32
    %c0_i32_0 = arith.constant 0 : i32
    %c0_i32_1 = arith.constant 0 : i32
    return %c0_i32, %c0_i32_0 : i32, i32
  }
  func.func @transform_8(%arg0: i32) -> (i32, i32) {
    %c0_i32 = arith.constant 0 : i32
    %c0_i32_0 = arith.constant 0 : i32
    %c0_i32_1 = arith.constant 0 : i32
    return %c0_i32, %c0_i32_0 : i32, i32
  }
  func.func @transform_9(%arg0: i32) -> (i32, i32) {
    %c0_i32 = arith.constant 0 : i32
    %c0_i32_0 = arith.constant 0 : i32
    %c0_i32_1 = arith.constant 0 : i32
    return %c0_i32, %c0_i32_0 : i32, i32
  }
  func.func @transform_10(%arg0: i32) -> (i32, i32) {
    %c0_i32 = arith.constant 0 : i32
    %c0_i32_0 = arith.constant 0 : i32
    %c0_i32_1 = arith.constant 0 : i32
    return %c0_i32, %c0_i32_0 : i32, i32
  }
  func.func @transform_11(%arg0: i32) -> (i32, i32) {
    %c0_i32 = arith.constant 0 : i32
    %c0_i32_0 = arith.constant 0 : i32
    return %arg0, %c0_i32 : i32, i32
  }
}

</mosaic_0001>

<bundles_post_ra>
// kernel: lightnet_forward.1
= control target key start
LH: loop header
LB: loop body
LE: loop exit
PB: predicated region body
PF: predicated region fallthrough
CT: control target
= control target key end

     0   :  { %17 = vsyncpa [#allocation8], 0  ;;  %s3043_s0 = inlined_call_operand.hbm [shape: f32[32,16], index: 0, kind: input, shape index: {}]   ;;  %s3044_s1 = inlined_call_operand.hbm [shape: f32[3,16,128], index: 1, kind: input, shape index: {}]   ;;  %s3045_s2 = inlined_call_operand.vmem [shape: f32[1,128], index: 2, kind: input, shape index: {}]   ;;  %s3046_s3 = inlined_call_operand.hbm [shape: f32[3,128,256], index: 3, kind: input, shape index: {}]   ;;  %s3047_s4 = inlined_call_operand.vmem [shape: f32[1,256], index: 4, kind: input, shape index: {}]   ;;  %s3048_s5 = inlined_call_operand.hbm [shape: f32[3,256,256], index: 5, kind: input, shape index: {}]   ;;  %s3049_s6 = inlined_call_operand.vmem [shape: f32[1,256], index: 6, kind: input, shape index: {}]   ;;  %s3050_s7 = inlined_call_operand.hbm [shape: f32[256,640], index: 7, kind: input, shape index: {}]   ;;  %s3051_s8 = inlined_call_operand.vmem [shape: f32[1,64], index: 8, kind: input, shape index: {}]   ;;  %s3052_s9 = inlined_call_operand.vmem [shape: f32[1,64], index: 9, kind: input, shape index: {}]   ;;  %s3053_s10 = inlined_call_operand.<no memory space> [shape: f32[1,1], index: 10, kind: input, shape index: {}]   ;;  %s3054_s11 = inlined_call_operand.vmem [shape: f32[2,1], index: 11, kind: output, shape index: {}]  }
   0x1   :  { %18 = vsyncpa [#allocation10], 0 }
   0x2   :  { %19 = vsyncpa [#allocation13], 0  ;;  %s2718_s17 = smov [#allocation9]   ;;  %s2602_s21 = scalar_lea.hbm %s3044_s1, 768 }
   0x3   :  { %s37_s18 = sshll.u32 %s2718_s17, 4  ;;  %p2603_p0 = scmp.ne.s32.totalorder %s3044_s1, %s2602_s21  ;;  %s38_s18 = int_to_ptr.vmem [resolvable:$true] %s37_s18 }
   0x4   :  { %p2606_p1 = scmp.lt.u32.totalorder %s2602_s21, %s3044_s1 }
   0x6   :  { %p2608_p2 = pnand %p2606_p1, %p2603_p0 }
   0x8   :  { %2611 = shalt.err (!%p2608_p2)
}
   0x9   :  { %s2612_s26 = scalar_lea.vmem %s38_s18, 768  ;;  %p2617_p4 = scmp.lt.s32.totalorder %s38_s18, %s38_s18 }
   0xa   :  { %p2613_p3 = scmp.ne.s32.totalorder %s38_s18, %s2612_s26  ;;  %p2618_p5 = scmp.lt.s32.totalorder %s2612_s26, %s2612_s26 }
   0xc   :  { %p2619_p6 = por %p2618_p5, %p2617_p4 }
   0xe   :  { %p2620_p7 = pnand %p2619_p6, %p2613_p3 }
  0x10   :  { %2623 = shalt.err (!%p2620_p7)
}
  0x11   :  { %s2719_s27 = smov 128   ;;  %s2720_s28 = smov 8  }
  0x12   :  { %43 = dma.hbm_to_vmem [thread:$0]  %s3044_s1, 768, %s38_s18, [#allocation10], %s2719_s27, %s2719_s27, %s2720_s28  }
  0x13   :  { %s2721_s12 = smov [#allocation12]   ;;  %s2722_s14 = smov [#allocation7]  }
  0x14   :  { %s65_s13 = sshll.u32 %s2721_s12, 4  ;;  %s25_s15 = sshll.u32 %s2722_s14, 4  ;;  %s66_s13 = int_to_ptr.vmem [resolvable:$true] %s65_s13  ;;  %s26_s15 = int_to_ptr.vmem [resolvable:$true] %s25_s15 }
  0x15   :  { %s2624_s19 = scalar_lea.hbm %s3048_s5, 24576 }
  0x16   :  { %p2625_p8 = scmp.ne.s32.totalorder %s3048_s5, %s2624_s19  ;;  %p2628_p9 = scmp.lt.u32.totalorder %s2624_s19, %s3048_s5 }
  0x18   :  { %p2630_p10 = pnand %p2628_p9, %p2625_p8 }
  0x1a   :  { %2633 = shalt.err (!%p2630_p10)
}
  0x1b   :  { %s2634_s1 = scalar_lea.vmem %s66_s13, 24576  ;;  %p2639_p12 = scmp.lt.s32.totalorder %s66_s13, %s66_s13 }
  0x1c   :  { %p2635_p11 = scmp.ne.s32.totalorder %s66_s13, %s2634_s1  ;;  %p2640_p13 = scmp.lt.s32.totalorder %s2634_s1, %s2634_s1 }
  0x1e   :  { %p2641_p0 = por %p2640_p13, %p2639_p12 }
  0x20   :  { %p2642_p1 = pnand %p2641_p0, %p2635_p11 }
  0x22   :  { %2645 = shalt.err (!%p2642_p1)
}
  0x23   :  { %s2723_s18 = smov 256   ;;  %s2724_s24 = smov 16  }
  0x24   :  { %71 = dma.hbm_to_vmem [thread:$0]  %s3048_s5, 24576, %s66_s13, [#allocation13], %s2723_s18, %s2723_s18, %s2724_s24  }
  0x25   :  { %s2646_s12 = scalar_lea.hbm %s3043_s0, 512 }
  0x26   :  { %p2647_p2 = scmp.ne.s32.totalorder %s3043_s0, %s2646_s12  ;;  %p2650_p3 = scmp.lt.u32.totalorder %s2646_s12, %s3043_s0 }
  0x28   :  { %p2652_p4 = pnand %p2650_p3, %p2647_p2 }
  0x2a   :  { %2655 = shalt.err (!%p2652_p4)
}
  0x2b   :  { %s2656_s20 = scalar_lea.vmem %s26_s15, 512  ;;  %p2661_p6 = scmp.lt.s32.totalorder %s26_s15, %s26_s15 }
  0x2c   :  { %p2657_p5 = scmp.ne.s32.totalorder %s26_s15, %s2656_s20  ;;  %p2662_p7 = scmp.lt.s32.totalorder %s2656_s20, %s2656_s20 }
  0x2e   :  { %p2663_p8 = por %p2662_p7, %p2661_p6 }
  0x30   :  { %p2664_p9 = pnand %p2663_p8, %p2657_p5 }
  0x32   :  { %2667 = shalt.err (!%p2664_p9)
}
  0x33   :  { %31 = dma.hbm_to_vmem [thread:$0]  %s3043_s0, 512, %s26_s15, [#allocation8], %s2719_s27, %s2719_s27, %s2720_s28  }
  0x34   :  { %s2725_s21 = smov [#allocation11]   ;;  %s2726_s23 = smov [#allocation14]  }
  0x35   :  { %s51_s22 = sshll.u32 %s2725_s21, 4  ;;  %s79_s1 = sshll.u32 %s2726_s23, 4  ;;  %s52_s22 = int_to_ptr.vmem [resolvable:$true] %s51_s22  ;;  %s80_s1 = int_to_ptr.vmem [resolvable:$true] %s79_s1 }
  0x36   :  { %s2668_s29 = scalar_lea.hbm %s3046_s3, 12288 }
  0x37   :  { %p2669_p10 = scmp.ne.s32.totalorder %s3046_s3, %s2668_s29  ;;  %p2672_p11 = scmp.lt.u32.totalorder %s2668_s29, %s3046_s3 }
  0x39   :  { %p2674_p12 = pnand %p2672_p11, %p2669_p10 }
  0x3b   :  { %2677 = shalt.err (!%p2674_p12)
}
  0x3c   :  { %s2678_s0 = scalar_lea.vmem %s52_s22, 12288  ;;  %p2683_p0 = scmp.lt.s32.totalorder %s52_s22, %s52_s22 }
  0x3d   :  { %p2679_p13 = scmp.ne.s32.totalorder %s52_s22, %s2678_s0  ;;  %p2684_p1 = scmp.lt.s32.totalorder %s2678_s0, %s2678_s0 }
  0x3f   :  { %p2685_p2 = por %p2684_p1, %p2683_p0 }
  0x41   :  { %p2686_p3 = pnand %p2685_p2, %p2679_p13 }
  0x43   :  { %2689 = shalt.err (!%p2686_p3)
}
  0x44   :  { %57 = dma.hbm_to_vmem [thread:$0]  %s3046_s3, 12288, %s52_s22, [#allocation10], %s2723_s18, %s2723_s18, %s2724_s24  }
  0x45   :  { %s2690_s19 = scalar_lea.hbm %s3050_s7, 20480 }
  0x46   :  { %p2691_p4 = scmp.ne.s32.totalorder %s3050_s7, %s2690_s19  ;;  %p2694_p5 = scmp.lt.u32.totalorder %s2690_s19, %s3050_s7 }
  0x48   :  { %p2696_p6 = pnand %p2694_p5, %p2691_p4 }
  0x4a   :  { %2699 = shalt.err (!%p2696_p6)
}
  0x4b   :  { %s2700_s23 = scalar_lea.vmem %s80_s1, 20480  ;;  %p2705_p8 = scmp.lt.s32.totalorder %s80_s1, %s80_s1 }
  0x4c   :  { %p2701_p7 = scmp.ne.s32.totalorder %s80_s1, %s2700_s23  ;;  %p2706_p9 = scmp.lt.s32.totalorder %s2700_s23, %s2700_s23 }
  0x4e   :  { %p2707_p10 = por %p2706_p9, %p2705_p8 }
  0x50   :  { %p2708_p11 = pnand %p2707_p10, %p2701_p7 }
  0x52   :  { %2711 = shalt.err (!%p2708_p11)
}
  0x53   :  { %s2727_s3 = smov 640   ;;  %s2728_s18 = smov 40  }
  0x54   :  { %85 = dma.hbm_to_vmem [thread:$0]  %s3050_s7, 20480, %s80_s1, [#allocation13], %s2727_s3, %s2727_s3, %s2728_s18  }
  0x55   :  { %2712 = dma.done.wait [#allocation8], 512  }
  0x56   :  { %2713 = vsyncadd [#allocation8], 4294966784 }
  0x57   :  { %2714 = dma.done.wait [#allocation10], 13056  }
  0x58   :  { %2715 = vsyncadd [#allocation10], 4294954240 }
  0x59   :  { %2716 = dma.done.wait [#allocation13], 45056  }
  0x5a   :  { %2717 = vsyncadd [#allocation13], 4294922240  ;;  %vm120_vm0 = vcmask 130048   ;;  %v111_v0 = vld [vmem:[#allocation9] sm:$0xff]  ;;  %v112_v1 = vld [vmem:[#allocation9 + $0x8] sm:$0xff]  ;;  %vm1012_vm1 = vcmask 1046528  }
  0x5b   :  { %v107_v2 = vld [vmem:[#allocation7] sm:$0xff]  ;;  %v2093_v3 = vpack.c.bf16 %v112_v1, %v111_v0  ;;  %v321_v5 = vld [vmem:[#allocation9 + $0x28] sm:$0xff]  ;;  %v118_v7 = vld [vmem:[#allocation9 + $0x10] sm:$0xff]  ;;  %vm1286_vm2 = vcmask 1045504   ;;  %vm1905_vm3 = vcmask 516096   ;;  %vm1966_vm4 = vcmask 517120  }
  0x5c   :  { %2073 = vmatprep.mubr.msk.f32.mxu0 %vm120_vm0, %v107_v2  ;;  %v320_v4 = vld [vmem:[#allocation9 + $0x20] sm:$0xff]  ;;  %v119_v8 = vld [vmem:[#allocation9 + $0x18] sm:$0xff]  ;;  %v108_v11 = vld [vmem:[#allocation7 + $0x8] sm:$0xff]  ;;  %vm1973_vm5 = vcmask 1024  }
  0x5d   :  { %v2097_v6 = vpack.c.bf16 %v321_v5, %v320_v4  ;;  %2094 = vmatprep.subr.bf16.mxu0 %v2093_v3  ;;  %v2089_v9 = vpack.c.bf16 %v119_v8, %v118_v7  ;;  %v113_v10 = vld [vmem:[#allocation7 + $0x1] sm:$0xff]  ;;  %v109_v12 = vld [vmem:[#allocation7 + $0x10] sm:$0xff]  ;;  %v110_v15 = vld [vmem:[#allocation7 + $0x18] sm:$0x3f]  ;;  %v2729_v7 = vmov 0.0  }
  0x5e   :  { %2096 = vmatpush3.bf16.msra.mxu0 %v2093_v3  ;;  %2063 = vmatprep.mubr.msk.f32.mxu1 %vm120_vm0, %v113_v10  ;;  %v114_v13 = vld [vmem:[#allocation7 + $0x9] sm:$0xff]  ;;  %v115_v14 = vld [vmem:[#allocation7 + $0x11] sm:$0xff]  ;;  %v485_v20 = vld [vmem:[#allocation11 + $0x110] sm:$0xff]  ;;  %1442 = vst [vmem:[#allocation4 + $0x30] sm:$0xfc] %v2729_v7 }
  0x5f   :  { %2098 = vmatprep.subr.bf16.mxu0 %v2097_v6  ;;  %2090 = vmatprep.subr.bf16.mxu1 %v2089_v9  ;;  %v484_v16 = vld [vmem:[#allocation11 + $0x108] sm:$0xff]  ;;  %v486_v17 = vld [vmem:[#allocation11 + $0x118] sm:$0xff]  ;;  %v483_v18 = vld [vmem:[#allocation11 + $0x100] sm:$0xff]  ;;  %1443 = vst [vmem:[#allocation4 + $0x38] sm:$0xfc] %v2729_v7 }
  0x60   :  { %2092 = vmatpush3.bf16.msra.mxu1 %v2089_v9  ;;  %v2101_v19 = vpack.c.bf16 %v486_v17, %v484_v16  ;;  %v488_v21 = vld [vmem:[#allocation11 + $0x128] sm:$0xff]  ;;  %v490_v22 = vld [vmem:[#allocation11 + $0x138] sm:$0xff]  ;;  %v2103_v23 = vpack.c.bf16 %v485_v20, %v483_v18  ;;  %v487_v25 = vld [vmem:[#allocation11 + $0x120] sm:$0xff] }
  0x61   :  { %2074 = vmatmul.mubr.msk.f32.vlgmr.msra.gmra.mrb[0].mxu0 %vm120_vm0, %v108_v11  ;;  %v2105_v24 = vpack.c.bf16 %v490_v22, %v488_v21  ;;  %v489_v26 = vld [vmem:[#allocation11 + $0x130] sm:$0xff]  ;;  %v492_v27 = vld [vmem:[#allocation11 + $0x148] sm:$0xff]  ;;  %v494_v29 = vld [vmem:[#allocation11 + $0x158] sm:$0xff] }
  0x62   :  { %2100 = vmatpush3.bf16.msra.mxu0 %v2097_v6  ;;  %2076 = vmatprep.mubr.msk.f32.mxu0 %vm120_vm0, %v109_v12  ;;  %v315_v28 = vld [vmem:[#allocation7 + $0x2] sm:$0xff]  ;;  %v116_v30 = vld [vmem:[#allocation7 + $0x19] sm:$0x3f]  ;;  %v2107_v31 = vpack.c.bf16 %v489_v26, %v487_v25  ;;  %v2109_v32 = vpack.c.bf16 %v494_v29, %v492_v27  ;;  %v491_v33 = vld [vmem:[#allocation11 + $0x140] sm:$0xff] }
  0x63   :  { %2064 = vmatmul.mubr.msk.f32.vlgmr.msra.gmra.mrb[0].mxu1 %vm120_vm0, %v114_v13  ;;  %2102 = vmatprep.subr.bf16.mxu1 %v2101_v19  ;;  %v493_v34 = vld [vmem:[#allocation11 + $0x150] sm:$0xff]  ;;  %v316_v35 = vld [vmem:[#allocation7 + $0xa] sm:$0xff]  ;;  %v496_v36 = vld [vmem:[#allocation11 + $0x168] sm:$0xff] }
  0x64   :  { %2066 = vmatprep.mubr.msk.f32.mxu1 %vm120_vm0, %v115_v14  ;;  %2104 = vmatpush1.bf16.msra.mxu1 %v2103_v23  ;;  %v498_v37 = vld [vmem:[#allocation11 + $0x178] sm:$0xff]  ;;  %v317_v38 = vld [vmem:[#allocation7 + $0x12] sm:$0xff]  ;;  %v2111_v39 = vpack.c.bf16 %v493_v34, %v491_v33  ;;  %v497_v42 = vld [vmem:[#allocation11 + $0x170] sm:$0xff] }
  0x65   :  { %2077 = vmatmul.mubr.msk.f32.gmra.mrb[2].mxu0 %vm120_vm0, %v110_v15  ;;  %2106 = vmatprep.subr.bf16.mxu1 %v2105_v24  ;;  %v2113_v40 = vpack.c.bf16 %v498_v37, %v496_v36  ;;  %v495_v41 = vld [vmem:[#allocation11 + $0x160] sm:$0xff]  ;;  %v318_v43 = vld [vmem:[#allocation7 + $0x1a] sm:$0x3f]  ;;  %v502_v45 = vld [vmem:[#allocation11 + $0x198] sm:$0xff] }
  0x66   :  { %2083 = vmatprep.mubr.msk.f32.mxu0 %vm120_vm0, %v315_v28  ;;  %v500_v44 = vld [vmem:[#allocation11 + $0x188] sm:$0xff]  ;;  %v2115_v46 = vpack.c.bf16 %v497_v42, %v495_v41  ;;  %v499_v48 = vld [vmem:[#allocation11 + $0x180] sm:$0xff]  ;;  %v501_v49 = vld [vmem:[#allocation11 + $0x190] sm:$0xff] }
  0x67   :  { %2067 = vmatmul.mubr.msk.f32.gmra.mrb[2].mxu1 %vm120_vm0, %v116_v30  ;;  %v2117_v47 = vpack.c.bf16 %v502_v45, %v500_v44  ;;  %v2119_v50 = vpack.c.bf16 %v501_v49, %v499_v48  ;;  %v504_v51 = vld [vmem:[#allocation11 + $0x1a8] sm:$0xff]  ;;  %v506_v52 = vld [vmem:[#allocation11 + $0x1b8] sm:$0xff]  ;;  %v503_v54 = vld [vmem:[#allocation11 + $0x1a0] sm:$0xff] }
  0x68   :  { %2108 = vmatpush1.bf16.msra.mxu1 %v2107_v31  ;;  %v2121_v53 = vpack.c.bf16 %v506_v52, %v504_v51  ;;  %v505_v55 = vld [vmem:[#allocation11 + $0x1b0] sm:$0xff]  ;;  %v508_v57 = vld [vmem:[#allocation11 + $0x1c8] sm:$0xff]  ;;  %v510_v58 = vld [vmem:[#allocation11 + $0x1d8] sm:$0xff]  ;;  %579 = vmatprep.mubr.f32.mxu1 %v2729_v7 }
  0x69   :  { %2084 = vmatmul.mubr.msk.f32.vlgmr.msra.gmra.mrb[0].mxu0 %vm120_vm0, %v316_v35  ;;  %2110 = vmatprep.subr.bf16.mxu1 %v2109_v32  ;;  %v2123_v56 = vpack.c.bf16 %v505_v55, %v503_v54  ;;  %v2125_v59 = vpack.c.bf16 %v510_v58, %v508_v57  ;;  %v507_v60 = vld [vmem:[#allocation11 + $0x1c0] sm:$0xff]  ;;  %v509_v61 = vld [vmem:[#allocation11 + $0x1d0] sm:$0xff]  ;;  %v512_v63 = vld [vmem:[#allocation11 + $0x1e8] sm:$0xff] }
  0x6a   :  { %2086 = vmatprep.mubr.msk.f32.mxu0 %vm120_vm0, %v317_v38  ;;  %v2127_v62 = vpack.c.bf16 %v509_v61, %v507_v60  ;;  %v514_v0 = vld [vmem:[#allocation11 + $0x1f8] sm:$0xff]  ;;  %v511_v2 = vld [vmem:[#allocation11 + $0x1e0] sm:$0xff]  ;;  %v513_v3 = vld [vmem:[#allocation11 + $0x1f0] sm:$0xff] }
  0x6b   :  { %v2129_v1 = vpack.c.bf16 %v514_v0, %v512_v63  ;;  %v2131_v4 = vpack.c.bf16 %v513_v3, %v511_v2  ;;  %v447_v5 = vld [vmem:[#allocation11 + $0x8] sm:$0xff]  ;;  %v449_v6 = vld [vmem:[#allocation11 + $0x18] sm:$0xff]  ;;  %v940_v11 = vld [vmem:[#allocation12 + $0x200] sm:$0xff] }
  0x6c   :  { %2112 = vmatpush1.bf16.msra.mxu1 %v2111_v39  ;;  %v2133_v8 = vpack.c.bf16 %v449_v6, %v447_v5  ;;  %v941_v9 = vld [vmem:[#allocation12 + $0x208] sm:$0xff]  ;;  %v943_v10 = vld [vmem:[#allocation12 + $0x218] sm:$0xff]  ;;  %v942_v13 = vld [vmem:[#allocation12 + $0x210] sm:$0xff] }
  0x6d   :  { %2087 = vmatmul.mubr.msk.f32.gmra.mrb[2].mxu0 %vm120_vm0, %v318_v43  ;;  %2114 = vmatprep.subr.bf16.mxu1 %v2113_v40  ;;  %v2197_v12 = vpack.c.bf16 %v943_v10, %v941_v9  ;;  %v945_v14 = vld [vmem:[#allocation12 + $0x228] sm:$0xff]  ;;  %v947_v15 = vld [vmem:[#allocation12 + $0x238] sm:$0xff]  ;;  %v2199_v16 = vpack.c.bf16 %v942_v13, %v940_v11  ;;  %v944_v18 = vld [vmem:[#allocation12 + $0x220] sm:$0xff] }
  0x6e   :  { %v2201_v17 = vpack.c.bf16 %v947_v15, %v945_v14  ;;  %v946_v19 = vld [vmem:[#allocation12 + $0x230] sm:$0xff]  ;;  %v949_v20 = vld [vmem:[#allocation12 + $0x248] sm:$0xff]  ;;  %v951_v21 = vld [vmem:[#allocation12 + $0x258] sm:$0xff] }
  0x6f   :  { %2198 = vmatprep.subr.bf16.mxu0 %v2197_v12  ;;  %v2203_v22 = vpack.c.bf16 %v946_v19, %v944_v18  ;;  %v2205_v23 = vpack.c.bf16 %v951_v21, %v949_v20  ;;  %v948_v24 = vld [vmem:[#allocation12 + $0x240] sm:$0xff]  ;;  %v950_v25 = vld [vmem:[#allocation12 + $0x250] sm:$0xff]  ;;  %v953_v26 = vld [vmem:[#allocation12 + $0x268] sm:$0xff] }
  0x70   :  { %2116 = vmatpush1.bf16.msra.mxu1 %v2115_v46  ;;  %2200 = vmatpush1.bf16.msra.mxu0 %v2199_v16  ;;  %v955_v27 = vld [vmem:[#allocation12 + $0x278] sm:$0xff]  ;;  %v2207_v28 = vpack.c.bf16 %v950_v25, %v948_v24  ;;  %v952_v30 = vld [vmem:[#allocation12 + $0x260] sm:$0xff]  ;;  %v954_v31 = vld [vmem:[#allocation12 + $0x270] sm:$0xff] }
  0x71   :  { %2118 = vmatprep.subr.bf16.mxu1 %v2117_v47  ;;  %2202 = vmatprep.subr.bf16.mxu0 %v2201_v17  ;;  %v2209_v29 = vpack.c.bf16 %v955_v27, %v953_v26  ;;  %v957_v32 = vld [vmem:[#allocation12 + $0x288] sm:$0xff]  ;;  %v959_v33 = vld [vmem:[#allocation12 + $0x298] sm:$0xff]  ;;  %v2211_v34 = vpack.c.bf16 %v954_v31, %v952_v30  ;;  %v956_v36 = vld [vmem:[#allocation12 + $0x280] sm:$0xff] }
  0x72   :  { %v2213_v35 = vpack.c.bf16 %v959_v33, %v957_v32  ;;  %v958_v37 = vld [vmem:[#allocation12 + $0x290] sm:$0xff]  ;;  %v961_v38 = vld [vmem:[#allocation12 + $0x2a8] sm:$0xff]  ;;  %v963_v39 = vld [vmem:[#allocation12 + $0x2b8] sm:$0xff] }
  0x73   :  { %v2215_v40 = vpack.c.bf16 %v958_v37, %v956_v36  ;;  %v2217_v41 = vpack.c.bf16 %v963_v39, %v961_v38  ;;  %v960_v42 = vld [vmem:[#allocation12 + $0x2a0] sm:$0xff]  ;;  %v962_v43 = vld [vmem:[#allocation12 + $0x2b0] sm:$0xff]  ;;  %v965_v44 = vld [vmem:[#allocation12 + $0x2c8] sm:$0xff] }
  0x74   :  { %2120 = vmatpush1.bf16.msra.mxu1 %v2119_v50  ;;  %2204 = vmatpush1.bf16.msra.mxu0 %v2203_v22  ;;  %v967_v45 = vld [vmem:[#allocation12 + $0x2d8] sm:$0xff]  ;;  %v2219_v46 = vpack.c.bf16 %v962_v43, %v960_v42  ;;  %v964_v48 = vld [vmem:[#allocation12 + $0x2c0] sm:$0xff]  ;;  %v966_v49 = vld [vmem:[#allocation12 + $0x2d0] sm:$0xff] }
  0x75   :  { %2122 = vmatprep.subr.bf16.mxu1 %v2121_v53  ;;  %2206 = vmatprep.subr.bf16.mxu0 %v2205_v23  ;;  %v2221_v47 = vpack.c.bf16 %v967_v45, %v965_v44  ;;  %v969_v50 = vld [vmem:[#allocation12 + $0x2e8] sm:$0xff]  ;;  %v971_v51 = vld [vmem:[#allocation12 + $0x2f8] sm:$0xff]  ;;  %v2223_v52 = vpack.c.bf16 %v966_v49, %v964_v48  ;;  %v968_v54 = vld [vmem:[#allocation12 + $0x2e0] sm:$0xff] }
  0x76   :  { %v2225_v53 = vpack.c.bf16 %v971_v51, %v969_v50  ;;  %v970_v55 = vld [vmem:[#allocation12 + $0x2f0] sm:$0xff]  ;;  %v975_v57 = vld [vmem:[#allocation12 + $0x318] sm:$0xff]  ;;  %v972_v60 = vld [vmem:[#allocation12 + $0x300] sm:$0xff] }
  0x77   :  { %v2227_v58 = vpack.c.bf16 %v970_v55, %v968_v54  ;;  %v974_v61 = vld [vmem:[#allocation12 + $0x310] sm:$0xff]  ;;  %v977_v63 = vld [vmem:[#allocation12 + $0x328] sm:$0xff]  ;;  %v979_v0 = vld [vmem:[#allocation12 + $0x338] sm:$0xff] }
  0x78   :  { %2124 = vmatpush1.bf16.msra.mxu1 %v2123_v56  ;;  %2208 = vmatpush1.bf16.msra.mxu0 %v2207_v28  ;;  %v973_v56 = vld [vmem:[#allocation12 + $0x308] sm:$0xff]  ;;  %v2231_v2 = vpack.c.bf16 %v974_v61, %v972_v60  ;;  %v2233_v3 = vpack.c.bf16 %v979_v0, %v977_v63  ;;  %v978_v5 = vld [vmem:[#allocation12 + $0x330] sm:$0xff]  ;;  %v983_v9 = vld [vmem:[#allocation12 + $0x358] sm:$0xff] }
  0x79   :  { %2126 = vmatprep.subr.bf16.mxu1 %v2125_v59  ;;  %2210 = vmatprep.subr.bf16.mxu0 %v2209_v29  ;;  %v2229_v59 = vpack.c.bf16 %v975_v57, %v973_v56  ;;  %v1994_v12 = vld [vmem:[%s3045_s2] ss:$0 sm:$0xff]  ;;  %v980_v17 = vld [vmem:[#allocation12 + $0x340] sm:$0xff]  ;;  %v982_v18 = vld [vmem:[#allocation12 + $0x350] sm:$0xff] }
  0x7a   :  { %v2239_v23 = vpack.c.bf16 %v982_v18, %v980_v17  ;;  %v446_v33 = vld [vmem:[#allocation11] sm:$0xff]  ;;  %v453_v36 = vld [vmem:[#allocation11 + $0x38] sm:$0xff]  ;;  %v455_v42 = vld [vmem:[#allocation11 + $0x48] sm:$0xff] }
  0x7b   :  { %v450_v39 = vld [vmem:[#allocation11 + $0x20] sm:$0xff]  ;;  %v457_v43 = vld [vmem:[#allocation11 + $0x58] sm:$0xff]  ;;  %v459_v49 = vld [vmem:[#allocation11 + $0x68] sm:$0xff] }
  0x7c   :  { %2128 = vmatpush1.bf16.msra.mxu1 %v2127_v62  ;;  %2212 = vmatpush1.bf16.msra.mxu0 %v2211_v34  ;;  %v448_v34 = vld [vmem:[#allocation11 + $0x10] sm:$0xff]  ;;  %v2141_v45 = vpack.c.bf16 %v457_v43, %v455_v42  ;;  %v461_v50 = vld [vmem:[#allocation11 + $0x78] sm:$0xff]  ;;  %v463_v56 = vld [vmem:[#allocation11 + $0x88] sm:$0xff] }
  0x7d   :  { %2130 = vmatprep.subr.bf16.mxu1 %v2129_v1  ;;  %2214 = vmatprep.subr.bf16.mxu0 %v2213_v35  ;;  %v451_v35 = vld [vmem:[#allocation11 + $0x28] sm:$0xff]  ;;  %v2135_v37 = vpack.c.bf16 %v448_v34, %v446_v33  ;;  %v460_v54 = vld [vmem:[#allocation11 + $0x70] sm:$0xff]  ;;  %v465_v57 = vld [vmem:[#allocation11 + $0x98] sm:$0xff] }
  0x7e   :  { %v2137_v38 = vpack.c.bf16 %v453_v36, %v451_v35  ;;  %v462_v60 = vld [vmem:[#allocation11 + $0x80] sm:$0xff]  ;;  %v464_v61 = vld [vmem:[#allocation11 + $0x90] sm:$0xff]  ;;  %v467_v63 = vld [vmem:[#allocation11 + $0xa8] sm:$0xff] }
  0x7f   :  { %v469_v0 = vld [vmem:[#allocation11 + $0xb8] sm:$0xff]  ;;  %v476_v17 = vld [vmem:[#allocation11 + $0xf0] sm:$0xff]  ;;  %v699_v18 = vld [vmem:[#allocation11 + $0x208] sm:$0xff] }
  0x80   :  { %2132 = vmatpush1.bf16.msra.mxu1 %v2131_v4  ;;  %2216 = vmatpush1.bf16.msra.mxu0 %v2215_v40  ;;  %v976_v4 = vld [vmem:[#allocation12 + $0x320] sm:$0xff]  ;;  %v452_v40 = vld [vmem:[#allocation11 + $0x30] sm:$0xff]  ;;  %v707_v36 = vld [vmem:[#allocation11 + $0x248] sm:$0xff] }
  0x81   :  { %2134 = vmatprep.subr.bf16.mxu1 %v2133_v8  ;;  %2218 = vmatprep.subr.bf16.mxu0 %v2217_v41  ;;  %v981_v8 = vld [vmem:[#allocation12 + $0x348] sm:$0xff]  ;;  %v2235_v13 = vpack.c.bf16 %v978_v5, %v976_v4  ;;  %v2139_v44 = vpack.c.bf16 %v452_v40, %v450_v39  ;;  %v468_v4 = vld [vmem:[#allocation11 + $0xb0] sm:$0xff]  ;;  %v702_v34 = vld [vmem:[#allocation11 + $0x220] sm:$0xff] }
  0x82   :  { %v2237_v16 = vpack.c.bf16 %v983_v9, %v981_v8  ;;  %v471_v5 = vld [vmem:[#allocation11 + $0xc8] sm:$0xff]  ;;  %v704_v35 = vld [vmem:[#allocation11 + $0x230] sm:$0xff]  ;;  %v706_v40 = vld [vmem:[#allocation11 + $0x240] sm:$0xff] }
  0x83   :  { %v711_v42 = vld [vmem:[#allocation11 + $0x268] sm:$0xff]  ;;  %v713_v43 = vld [vmem:[#allocation11 + $0x278] sm:$0xff] }
  0x84   :  { %2220 = vmatpush1.bf16.msra.mxu0 %v2219_v46  ;;  %v454_v46 = vld [vmem:[#allocation11 + $0x40] sm:$0xff] }
  0x85   :  { %2222 = vmatprep.subr.bf16.mxu0 %v2221_v47  ;;  %v456_v47 = vld [vmem:[#allocation11 + $0x50] sm:$0xff] }
  0x86   :  { %v2143_v51 = vpack.c.bf16 %v456_v47, %v454_v46  ;;  %v715_v46 = vld [vmem:[#allocation11 + $0x288] sm:$0xff]  ;;  %v717_v47 = vld [vmem:[#allocation11 + $0x298] sm:$0xff] }
  0x88   :  { %2224 = vmatpush1.bf16.msra.mxu0 %v2223_v52  ;;  %v2145_v52 = vpack.c.bf16 %v461_v50, %v459_v49  ;;  %v716_v49 = vld [vmem:[#allocation11 + $0x290] sm:$0xff] }
  0x89   :  { %2226 = vmatprep.subr.bf16.mxu0 %v2225_v53  ;;  %v458_v53 = vld [vmem:[#allocation11 + $0x60] sm:$0xff] }
  0x8c   :  { %2228 = vmatpush1.bf16.msra.mxu0 %v2227_v58  ;;  %v2147_v58 = vpack.c.bf16 %v460_v54, %v458_v53 }
  0x8d   :  { %2230 = vmatprep.subr.bf16.mxu0 %v2229_v59  ;;  %v2149_v59 = vpack.c.bf16 %v465_v57, %v463_v56  ;;  %v725_v56 = vld [vmem:[#allocation11 + $0x2d8] sm:$0xff] }
  0x90   :  { %2232 = vmatpush1.bf16.msra.mxu0 %v2231_v2  ;;  %v2153_v2 = vpack.c.bf16 %v469_v0, %v467_v63 }
  0x91   :  { %2234 = vmatprep.subr.bf16.mxu0 %v2233_v3  ;;  %v466_v3 = vld [vmem:[#allocation11 + $0xa0] sm:$0xff] }
  0x92   :  { %v2155_v8 = vpack.c.bf16 %v468_v4, %v466_v3 }
  0x94   :  { %2236 = vmatpush1.bf16.msra.mxu0 %v2235_v13  ;;  %v477_v13 = vld [vmem:[#allocation11 + $0xf8] sm:$0xff] }
  0x95   :  { %2238 = vmatprep.subr.bf16.mxu0 %v2237_v16  ;;  %v474_v16 = vld [vmem:[#allocation11 + $0xe0] sm:$0xff] }
  0x98   :  { %2240 = vmatpush1.bf16.msra.mxu0 %v2239_v23 }
 0x136   :  { %v2065_v62 = vpop.f32.mrb[0].mxu1 }
 0x137   :  { %v199_v1 = vpop.f32.mrb[1].mxu1 }
 0x13a   :  { %v2068_v6 = vpop.f32.mrb[2].mxu1 }
 0x13b   :  { %v209_v10 = vpop.f32.mrb[3].mxu1 }
 0x13c   :  { %v2085_v11 = vpop.f32.mrb[0].mxu0 }
 0x13d   :  { %v2549_v14 = vadd.f32 %v2085_v11, %v2065_v62  ;;  %v400_v15 = vpop.f32.mrb[1].mxu0  ;;  %v472_v11 = vld [vmem:[#allocation11 + $0xd0] sm:$0xff] }
 0x13e   :  { %v2550_v19 = vadd.f32 %v400_v15, %v199_v1  ;;  %v2151_v1 = vpack.c.bf16 %v464_v61, %v462_v60  ;;  %v724_v60 = vld [vmem:[#allocation11 + $0x2d0] sm:$0xff]  ;;  %v727_v61 = vld [vmem:[#allocation11 + $0x2e8] sm:$0xff] }
 0x13f   :  { %v2881_v20 = vadd.f32 %v2549_v14, %v1994_v12 }
 0x140   :  { %v2883_v21 = vadd.f32 %v2550_v19, %v1994_v12  ;;  %v2088_v22 = vpop.f32.mrb[2].mxu0  ;;  %v701_v19 = vld [vmem:[#allocation11 + $0x218] sm:$0xff] }
 0x141   :  { %v435_v24 = vmax.f32 %v2881_v20, 0.0  ;;  %v2551_v25 = vadd.f32 %v2088_v22, %v2068_v6  ;;  %v410_v26 = vpop.f32.mrb[3].mxu0  ;;  %v473_v6 = vld [vmem:[#allocation11 + $0xd8] sm:$0xff]  ;;  %v2163_v22 = vpack.c.bf16 %v476_v17, %v474_v16  ;;  %v2165_v23 = vpack.c.bf16 %v701_v19, %v699_v18  ;;  %v988_v18 = vld [vmem:[#allocation12 + $0x380] sm:$0xff]  ;;  %v990_v19 = vld [vmem:[#allocation12 + $0x390] sm:$0xff] }
 0x142   :  { %v434_v27 = vmax.f32 %v2883_v21, 0.0  ;;  %v2552_v28 = vadd.f32 %v410_v26, %v209_v10  ;;  %v2157_v9 = vpack.c.bf16 %v473_v6, %v471_v5  ;;  %v470_v10 = vld [vmem:[#allocation11 + $0xc0] sm:$0xff]  ;;  %v700_v26 = vld [vmem:[#allocation11 + $0x210] sm:$0xff]  ;;  %v2177_v21 = vpack.c.bf16 %v713_v43, %v711_v42  ;;  %v991_v16 = vld [vmem:[#allocation12 + $0x398] sm:$0xff] }
 0x143   :  { %439 = vst [vmem:[#allocation2 + $0x8] sm:$0xff] %v435_v24  ;;  %v433_v29 = vadd.f32 %v2551_v25, %v1994_v12  ;;  %v2159_v14 = vpack.c.bf16 %v472_v11, %v470_v10  ;;  %v698_v25 = vld [vmem:[#allocation11 + $0x200] sm:$0xff]  ;;  %v2181_v20 = vpack.c.bf16 %v717_v47, %v715_v46  ;;  %v987_v10 = vld [vmem:[#allocation12 + $0x378] sm:$0xff]  ;;  %v1002_v42 = vld [vmem:[#allocation12 + $0x3f0] sm:$0xff] }
 0x144   :  { %438 = vst [vmem:[#allocation2] sm:$0xff] %v434_v27  ;;  %v2891_v30 = vadd.f32 %v2552_v28, %v1994_v12  ;;  %v475_v12 = vld [vmem:[#allocation11 + $0xe8] sm:$0xff] }
 0x145   :  { %v437_v31 = vmax.f32 %v433_v29, 0.0  ;;  %v2161_v15 = vpack.c.bf16 %v477_v13, %v475_v12  ;;  %v703_v28 = vld [vmem:[#allocation11 + $0x228] sm:$0xff]  ;;  %v705_v29 = vld [vmem:[#allocation11 + $0x238] sm:$0xff]  ;;  %v984_v12 = vld [vmem:[#allocation12 + $0x360] sm:$0xff] }
 0x146   :  { %v436_v32 = vmax.f32 %v2891_v30, 0.0  ;;  %v2169_v33 = vpack.c.bf16 %v705_v29, %v703_v28  ;;  %v718_v30 = vld [vmem:[#allocation11 + $0x2a0] sm:$0xff]  ;;  %v986_v13 = vld [vmem:[#allocation12 + $0x370] sm:$0xff] }
 0x147   :  { %441 = vst [vmem:[#allocation2 + $0x18] sm:$0x3f] %v437_v31  ;;  %v2167_v31 = vpack.c.bf16 %v700_v26, %v698_v25  ;;  %v992_v26 = vld [vmem:[#allocation12 + $0x3a0] sm:$0xff]  ;;  %v994_v28 = vld [vmem:[#allocation12 + $0x3b0] sm:$0xff] }
 0x148   :  { %440 = vst [vmem:[#allocation2 + $0x10] sm:$0xff] %v436_v32  ;;  %v2251_v29 = vpack.c.bf16 %v994_v28, %v992_v26  ;;  %v877_v26 = vld [vmem:[#allocation12 + $0x30] sm:$0xff] }
 0x14b   :  { %v478_v41 = vld [vmem:[#allocation2 + $0x1] sm:$0xff] }
 0x14c   :  { %580 = vmatmul.mubr.f32.vlgmr.msra.gmra.mrb[4].mxu1 %v478_v41  ;;  %v708_v41 = vld [vmem:[#allocation11 + $0x250] sm:$0xff] }
 0x14d   :  { %2136 = vmatpush1.bf16.msra.mxu1 %v2135_v37  ;;  %585 = vmatprep.mubr.f32.mxu1 %v2729_v7  ;;  %v709_v37 = vld [vmem:[#allocation11 + $0x258] sm:$0xff]  ;;  %v693_v4 = vld [vmem:[#allocation2 + $0x2] sm:$0xff] }
 0x14e   :  { %2138 = vmatprep.subr.bf16.mxu1 %v2137_v38  ;;  %v481_v62 = vld [vmem:[#allocation2 + $0x19] sm:$0xf]  ;;  %v2171_v38 = vpack.c.bf16 %v704_v35, %v702_v34  ;;  %v2173_v39 = vpack.c.bf16 %v709_v37, %v707_v36  ;;  %v998_v36 = vld [vmem:[#allocation12 + $0x3d0] sm:$0xff] }
 0x14f   :  { %v479_v48 = vld [vmem:[#allocation2 + $0x9] sm:$0xff]  ;;  %v480_v55 = vld [vmem:[#allocation2 + $0x11] sm:$0xff] }
 0x150   :  { %586 = vmatmul.mubr.f32.gmra.mrb[6].mxu1 %v479_v48  ;;  %v445_v50 = vld [vmem:[#allocation2 + $0x18] sm:$0xf]  ;;  %v694_v5 = vld [vmem:[#allocation2 + $0xa] sm:$0xff] }
 0x151   :  { %2140 = vmatpush1.bf16.msra.mxu1 %v2139_v44  ;;  %591 = vmatprep.mubr.f32.mxu1 %v2729_v7  ;;  %v2175_v44 = vpack.c.bf16 %v708_v41, %v706_v40  ;;  %v695_v6 = vld [vmem:[#allocation2 + $0x12] sm:$0xff] }
 0x152   :  { %2142 = vmatprep.subr.bf16.mxu1 %v2141_v45  ;;  %v712_v45 = vld [vmem:[#allocation11 + $0x270] sm:$0xff]  ;;  %v996_v35 = vld [vmem:[#allocation12 + $0x3c0] sm:$0xff] }
 0x153   :  { %v2255_v37 = vpack.c.bf16 %v998_v36, %v996_v35  ;;  %v1000_v41 = vld [vmem:[#allocation12 + $0x3e0] sm:$0xff] }
 0x154   :  { %592 = vmatmul.mubr.f32.gmra.mrb[8].mxu1 %v480_v55  ;;  %v723_v55 = vld [vmem:[#allocation11 + $0x2c8] sm:$0xff]  ;;  %v2259_v43 = vpack.c.bf16 %v1002_v42, %v1000_v41  ;;  %v886_v41 = vld [vmem:[#allocation12 + $0x78] sm:$0xff] }
 0x155   :  { %2144 = vmatpush1.bf16.msra.mxu1 %v2143_v51  ;;  %597 = vmatprep.mubr.f32.mxu1 %v2729_v7  ;;  %v719_v51 = vld [vmem:[#allocation11 + $0x2a8] sm:$0xff] }
 0x156   :  { %2146 = vmatprep.subr.bf16.mxu1 %v2145_v52  ;;  %v721_v52 = vld [vmem:[#allocation11 + $0x2b8] sm:$0xff] }
 0x157   :  { %v2185_v54 = vpack.c.bf16 %v721_v52, %v719_v51 }
 0x158   :  { %598 = vmatmul.mubr.f32.gmra.mrb[10].mxu1 %v481_v62  ;;  %v729_v62 = vld [vmem:[#allocation11 + $0x2f8] sm:$0xff] }
 0x159   :  { %2148 = vmatpush1.bf16.msra.mxu1 %v2147_v58  ;;  %668 = vmatprep.mubr.f32.mxu1 %v2729_v7  ;;  %v2189_v58 = vpack.c.bf16 %v725_v56, %v723_v55  ;;  %v2193_v0 = vpack.c.bf16 %v729_v62, %v727_v61 }
 0x15a   :  { %2150 = vmatprep.subr.bf16.mxu1 %v2149_v59  ;;  %v722_v59 = vld [vmem:[#allocation11 + $0x2c0] sm:$0xff] }
 0x15b   :  { %v2191_v63 = vpack.c.bf16 %v724_v60, %v722_v59 }
 0x15d   :  { %2152 = vmatpush1.bf16.msra.mxu1 %v2151_v1  ;;  %v726_v1 = vld [vmem:[#allocation11 + $0x2e0] sm:$0xff] }
 0x15e   :  { %2154 = vmatprep.subr.bf16.mxu1 %v2153_v2  ;;  %v728_v2 = vld [vmem:[#allocation11 + $0x2f0] sm:$0xff] }
 0x15f   :  { %v2195_v3 = vpack.c.bf16 %v728_v2, %v726_v1 }
 0x161   :  { %2156 = vmatpush1.bf16.msra.mxu1 %v2155_v8  ;;  %v696_v8 = vld [vmem:[#allocation2 + $0x1a] sm:$0xf] }
 0x162   :  { %2158 = vmatprep.subr.bf16.mxu1 %v2157_v9  ;;  %v985_v9 = vld [vmem:[#allocation12 + $0x368] sm:$0xff] }
 0x163   :  { %v2241_v11 = vpack.c.bf16 %v987_v10, %v985_v9 }
 0x165   :  { %2160 = vmatpush1.bf16.msra.mxu1 %v2159_v14  ;;  %v2243_v14 = vpack.c.bf16 %v986_v13, %v984_v12  ;;  %2242 = vmatprep.subr.bf16.mxu0 %v2241_v11  ;;  %v876_v11 = vld [vmem:[#allocation12 + $0x28] sm:$0xff]  ;;  %v878_v12 = vld [vmem:[#allocation12 + $0x38] sm:$0xff] }
 0x166   :  { %2162 = vmatprep.subr.bf16.mxu1 %v2161_v15  ;;  %v989_v15 = vld [vmem:[#allocation12 + $0x388] sm:$0xff] }
 0x167   :  { %2244 = vmatpush1.bf16.msra.mxu0 %v2243_v14  ;;  %v2245_v17 = vpack.c.bf16 %v991_v16, %v989_v15 }
 0x169   :  { %2164 = vmatpush1.bf16.msra.mxu1 %v2163_v22  ;;  %v2247_v22 = vpack.c.bf16 %v990_v19, %v988_v18  ;;  %2246 = vmatprep.subr.bf16.mxu0 %v2245_v17 }
 0x16a   :  { %2166 = vmatprep.subr.bf16.mxu1 %v2165_v23  ;;  %v993_v23 = vld [vmem:[#allocation12 + $0x3a8] sm:$0xff] }
 0x16b   :  { %2248 = vmatpush1.bf16.msra.mxu0 %v2247_v22 }
 0x16c   :  { %669 = vmatmul.mubr.f32.vlgmr.msra.gmra.mrb[4].mxu1 %v434_v27  ;;  %v710_v27 = vld [vmem:[#allocation11 + $0x260] sm:$0xff] }
 0x16d   :  { %2168 = vmatpush1.bf16.msra.mxu1 %v2167_v31  ;;  %674 = vmatprep.mubr.f32.mxu1 %v2729_v7  ;;  %v2179_v48 = vpack.c.bf16 %v712_v45, %v710_v27  ;;  %v997_v31 = vld [vmem:[#allocation12 + $0x3c8] sm:$0xff]  ;;  %v829_v45 = vlaneseq }
 0x16e   :  { %2170 = vmatprep.subr.bf16.mxu1 %v2169_v33  ;;  %v999_v33 = vld [vmem:[#allocation12 + $0x3d8] sm:$0xff] }
 0x16f   :  { %v2253_v34 = vpack.c.bf16 %v999_v33, %v997_v31  ;;  %v2913_v46 = vshrl.u32 %v829_v45, 7  ;;  %v880_v31 = vld [vmem:[#allocation12 + $0x48] sm:$0xff]  ;;  %v882_v33 = vld [vmem:[#allocation12 + $0x58] sm:$0xff] }
 0x170   :  { %675 = vmatmul.mubr.f32.gmra.mrb[6].mxu1 %v435_v24  ;;  %v714_v24 = vld [vmem:[#allocation11 + $0x280] sm:$0xff]  ;;  %v2269_v36 = vpack.c.bf16 %v882_v33, %v880_v31  ;;  %v897_v33 = vld [vmem:[#allocation12 + $0xd0] sm:$0xff] }
 0x171   :  { %2172 = vmatpush1.bf16.msra.mxu1 %v2171_v38  ;;  %680 = vmatprep.mubr.f32.mxu1 %v2729_v7  ;;  %v2183_v53 = vpack.c.bf16 %v716_v49, %v714_v24  ;;  %v1001_v38 = vld [vmem:[#allocation12 + $0x3e8] sm:$0xff]  ;;  %v831_v47 = vsub.s32 0, %v2913_v46 }
 0x172   :  { %2174 = vmatprep.subr.bf16.mxu1 %v2173_v39  ;;  %v1003_v39 = vld [vmem:[#allocation12 + $0x3f8] sm:$0xff] }
 0x173   :  { %v2257_v40 = vpack.c.bf16 %v1003_v39, %v1001_v38  ;;  %v881_v38 = vld [vmem:[#allocation12 + $0x50] sm:$0xff] }
 0x174   :  { %681 = vmatmul.mubr.f32.gmra.mrb[8].mxu1 %v436_v32  ;;  %v720_v32 = vld [vmem:[#allocation11 + $0x2b0] sm:$0xff] }
 0x175   :  { %2176 = vmatpush1.bf16.msra.mxu1 %v2175_v44  ;;  %686 = vmatprep.mubr.f32.mxu1 %v2729_v7  ;;  %v2187_v57 = vpack.c.bf16 %v720_v32, %v718_v30  ;;  %v872_v44 = vld [vmem:[#allocation12 + $0x8] sm:$0xff] }
 0x176   :  { %2178 = vmatprep.subr.bf16.mxu1 %v2177_v21  ;;  %v874_v21 = vld [vmem:[#allocation12 + $0x18] sm:$0xff] }
 0x177   :  { %v2261_v27 = vpack.c.bf16 %v874_v21, %v872_v44  ;;  %v883_v21 = vld [vmem:[#allocation12 + $0x60] sm:$0xff] }
 0x178   :  { %687 = vmatmul.mubr.f32.gmra.mrb[10].mxu1 %v445_v50 }
 0x179   :  { %2180 = vmatpush1.bf16.msra.mxu1 %v2179_v48  ;;  %794 = vmatprep.mubr.f32.mxu1 %v2729_v7  ;;  %v827_v48 = vld [vmem:[%s3047_s4] sm:$0x3] }
 0x17a   :  { %2182 = vmatprep.subr.bf16.mxu1 %v2181_v20  ;;  %v835_v20 = vsub.s32 1, %v2913_v46  ;;  %v832_v24 = vrot.slane %v827_v48, %v831_v47  ;;  %v1469_v46 = vld [vmem:[#allocation14 + $0x88] sm:$0xff] }
 0x17c   :  { %v836_v49 = vrot.slane %v827_v48, %v835_v20 }
 0x17d   :  { %2184 = vmatpush1.bf16.msra.mxu1 %v2183_v53 }
 0x17e   :  { %2186 = vmatprep.subr.bf16.mxu1 %v2185_v54 }
 0x181   :  { %2188 = vmatpush1.bf16.msra.mxu1 %v2187_v57 }
 0x182   :  { %2190 = vmatprep.subr.bf16.mxu1 %v2189_v58 }
 0x185   :  { %2192 = vmatpush1.bf16.msra.mxu1 %v2191_v63 }
 0x186   :  { %2194 = vmatprep.subr.bf16.mxu1 %v2193_v0 }
 0x189   :  { %2196 = vmatpush1.bf16.msra.mxu1 %v2195_v3 }
 0x18c   :  { %795 = vmatmul.mubr.f32.vlgmr.msra.gmra.mrb[4].mxu1 %v693_v4  ;;  %v871_v4 = vld [vmem:[#allocation12] sm:$0xff] }
 0x18d   :  { %800 = vmatprep.mubr.f32.mxu1 %v2729_v7 }
 0x190   :  { %801 = vmatmul.mubr.f32.gmra.mrb[6].mxu1 %v694_v5  ;;  %v873_v5 = vld [vmem:[#allocation12 + $0x10] sm:$0xff] }
 0x191   :  { %806 = vmatprep.mubr.f32.mxu1 %v2729_v7  ;;  %v2263_v19 = vpack.c.bf16 %v873_v5, %v871_v4  ;;  %v1458_v4 = vld [vmem:[#allocation14 + $0x30] sm:$0xff]  ;;  %v1452_v5 = vld [vmem:[#allocation14] sm:$0xff] }
 0x194   :  { %807 = vmatmul.mubr.f32.gmra.mrb[8].mxu1 %v695_v6 }
 0x195   :  { %812 = vmatprep.mubr.f32.mxu1 %v2729_v7  ;;  %v995_v7 = vld [vmem:[#allocation12 + $0x3b8] sm:$0xff] }
 0x196   :  { %v2249_v25 = vpack.c.bf16 %v995_v7, %v993_v23  ;;  %v2265_v7 = vpack.c.bf16 %v878_v12, %v876_v11  ;;  %v1468_v11 = vld [vmem:[#allocation14 + $0x80] sm:$0xff] }
 0x198   :  { %813 = vmatmul.mubr.f32.gmra.mrb[10].mxu1 %v696_v8  ;;  %2250 = vmatprep.subr.bf16.mxu0 %v2249_v25  ;;  %v875_v25 = vld [vmem:[#allocation12 + $0x20] sm:$0xff] }
 0x199   :  { %2252 = vmatpush1.bf16.msra.mxu0 %v2251_v29  ;;  %v2267_v35 = vpack.c.bf16 %v877_v26, %v875_v25  ;;  %v895_v25 = vld [vmem:[#allocation12 + $0xc0] sm:$0xff] }
 0x19a   :  { %2254 = vmatprep.subr.bf16.mxu0 %v2253_v34 }
 0x19d   :  { %2256 = vmatpush1.bf16.msra.mxu0 %v2255_v37  ;;  %v879_v37 = vld [vmem:[#allocation12 + $0x40] sm:$0xff] }
 0x19e   :  { %2258 = vmatprep.subr.bf16.mxu0 %v2257_v40  ;;  %v884_v40 = vld [vmem:[#allocation12 + $0x68] sm:$0xff]  ;;  %v2271_v42 = vpack.c.bf16 %v881_v38, %v879_v37  ;;  %v902_v37 = vld [vmem:[#allocation12 + $0xf8] sm:$0xff] }
 0x19f   :  { %v2273_v44 = vpack.c.bf16 %v886_v41, %v884_v40  ;;  %v1482_v40 = vld [vmem:[#allocation14 + $0xf0] sm:$0xff]  ;;  %v1487_v41 = vld [vmem:[#allocation14 + $0x118] sm:$0xff] }
 0x1a1   :  { %2260 = vmatpush1.bf16.msra.mxu0 %v2259_v43 }
 0x1a2   :  { %2262 = vmatprep.subr.bf16.mxu0 %v2261_v27  ;;  %v885_v27 = vld [vmem:[#allocation12 + $0x70] sm:$0xff] }
 0x25f   :  { %v796_v50 = vpop.f32.mrb[4].mxu1 }
 0x260   :  { %v2924_v51 = vadd.f32 %v832_v24, %v796_v50  ;;  %v798_v52 = vpop.f32.mrb[5].mxu1 }
 0x261   :  { %v2926_v53 = vadd.f32 %v836_v49, %v798_v52  ;;  %v2275_v52 = vpack.c.bf16 %v885_v27, %v883_v21  ;;  %v1498_v21 = vld [vmem:[#allocation14 + $0x170] sm:$0xff]  ;;  %v904_v27 = vld [vmem:[#allocation12 + $0x108] sm:$0xff] }
 0x262   :  { %v847_v54 = vmax.f32 %v2924_v51, 0.0 }
 0x263   :  { %v848_v30 = vmax.f32 %v2926_v53, 0.0  ;;  %v802_v32 = vpop.f32.mrb[6].mxu1  ;;  %v899_v53 = vld [vmem:[#allocation12 + $0xe0] sm:$0xff] }
 0x264   :  { %855 = vst [vmem:[#allocation3] sm:$0xff] %v847_v54  ;;  %v841_v55 = vadd.f32 %v832_v24, %v802_v32  ;;  %v804_v56 = vpop.f32.mrb[7].mxu1 }
 0x265   :  { %856 = vst [vmem:[#allocation3 + $0x8] sm:$0xff] %v848_v30  ;;  %v842_v57 = vadd.f32 %v836_v49, %v804_v56  ;;  %v887_v56 = vld [vmem:[#allocation12 + $0x80] sm:$0xff] }
 0x266   :  { %v2934_v58 = vmax.f32 %v841_v55, 0.0 }
 0x267   :  { %v2936_v59 = vmax.f32 %v842_v57, 0.0  ;;  %v808_v60 = vpop.f32.mrb[8].mxu1  ;;  %v889_v57 = vld [vmem:[#allocation12 + $0x90] sm:$0xff] }
 0x268   :  { %v843_v61 = vadd.f32 %v832_v24, %v808_v60  ;;  %v810_v62 = vpop.f32.mrb[9].mxu1  ;;  %v1014_v18 = vrot.slane %v2934_v58, 1 }
 0x269   :  { %v844_v63 = vadd.f32 %v836_v49, %v810_v62  ;;  %v1017_v15 = vrot.slane %v2936_v59, 1  ;;  %v894_v62 = vld [vmem:[#allocation12 + $0xb8] sm:$0xff] }
 0x26a   :  { %v2938_v0 = vmax.f32 %v843_v61, 0.0  ;;  %v892_v61 = vld [vmem:[#allocation12 + $0xa8] sm:$0xff] }
 0x26b   :  { %v2940_v1 = vmax.f32 %v844_v63, 0.0  ;;  %v814_v2 = vpop.f32.mrb[10].mxu1  ;;  %v935_v3 = vld [vmem:[#allocation3] sm:$0xfe]  ;;  %v891_v63 = vld [vmem:[#allocation12 + $0xa0] sm:$0xff]  ;;  %v2281_v12 = vpack.c.bf16 %v894_v62, %v892_v61  ;;  %v910_v62 = vld [vmem:[#allocation12 + $0x138] sm:$0xff] }
 0x26c   :  { %v845_v6 = vadd.f32 %v832_v24, %v814_v2  ;;  %v816_v8 = vpop.f32.mrb[11].mxu1  ;;  %v936_v9 = vld [vmem:[#allocation3 + $0x8] sm:$0xfe]  ;;  %v1013_v10 = vrot.slane %v935_v3, 1  ;;  %v1019_v29 = vrot.slane %v2938_v0, 1  ;;  %v888_v24 = vld [vmem:[#allocation12 + $0x88] sm:$0xff] }
 0x26d   :  { %v846_v13 = vadd.f32 %v836_v49, %v816_v8  ;;  %v1016_v14 = vrot.slane %v936_v9, 1  ;;  %v1021_v16 = vrot.slane %v2940_v1, 1  ;;  %v890_v49 = vld [vmem:[#allocation12 + $0x98] sm:$0xff]  ;;  %v893_v2 = vld [vmem:[#allocation12 + $0xb0] sm:$0xff]  ;;  %v1453_v3 = vld [vmem:[#allocation14 + $0x8] sm:$0xff] }
 0x26e   :  { %v853_v17 = vmax.f32 %v845_v6, 0.0  ;;  %v1015_v28 = vsel %vm1012_vm1, %v1013_v10, %v1014_v18  ;;  %v1020_v39 = vsel %vm1012_vm1, %v1014_v18, %v1019_v29  ;;  %v2277_v55 = vpack.c.bf16 %v890_v49, %v888_v24  ;;  %v1457_v9 = vld [vmem:[#allocation14 + $0x28] sm:$0xff]  ;;  %v1463_v10 = vld [vmem:[#allocation14 + $0x58] sm:$0xff]  ;;  %v903_v49 = vld [vmem:[#allocation12 + $0x100] sm:$0xff] }
 0x26f   :  { %v854_v22 = vmax.f32 %v846_v13, 0.0  ;;  %v1018_v23 = vsel %vm1012_vm1, %v1016_v14, %v1017_v15  ;;  %v1022_v34 = vsel %vm1012_vm1, %v1017_v15, %v1021_v16  ;;  %v2279_v6 = vpack.c.bf16 %v889_v57, %v887_v56  ;;  %v1462_v15 = vld [vmem:[#allocation14 + $0x50] sm:$0xff]  ;;  %v896_v18 = vld [vmem:[#allocation12 + $0xc8] sm:$0xff]  ;;  %v1503_v57 = vld [vmem:[#allocation14 + $0x198] sm:$0xff] }
 0x270   :  { %861 = vst [vmem:[#allocation3 + $0x30] sm:$0xf] %v853_v17  ;;  %1099 = vmatprep.mubr.f32.mxu0 %v1018_v23  ;;  %v2389_v8 = vpack.c.bf16 %v1458_v4, %v1453_v3  ;;  %v2391_v13 = vpack.c.bf16 %v1457_v9, %v1452_v5  ;;  %v2393_v14 = vpack.c.bf16 %v1468_v11, %v1463_v10  ;;  %v1473_v17 = vld [vmem:[#allocation14 + $0xa8] sm:$0xff]  ;;  %v905_v56 = vld [vmem:[#allocation12 + $0x110] sm:$0xff]  ;;  %v907_v3 = vld [vmem:[#allocation12 + $0x120] sm:$0xff] }
 0x271   :  { %862 = vst [vmem:[#allocation3 + $0x38] sm:$0xf] %v854_v22  ;;  %1100 = vmatmul.mubr.f32.vlgmr.msra.gmra.mrb[4].mxu0 %v1015_v28  ;;  %v1478_v22 = vld [vmem:[#allocation14 + $0xd0] sm:$0xff]  ;;  %v1472_v28 = vld [vmem:[#allocation14 + $0xa0] sm:$0xff]  ;;  %v908_v61 = vld [vmem:[#allocation12 + $0x128] sm:$0xff] }
 0x272   :  { %2264 = vmatpush1.bf16.msra.mxu0 %v2263_v19  ;;  %1105 = vmatprep.mubr.f32.mxu0 %v1022_v34  ;;  %v898_v19 = vld [vmem:[#allocation12 + $0xd8] sm:$0xff]  ;;  %v2397_v26 = vpack.c.bf16 %v1478_v22, %v1473_v17  ;;  %v1502_v5 = vld [vmem:[#allocation14 + $0x190] sm:$0xff]  ;;  %v1513_v10 = vld [vmem:[#allocation14 + $0x1e8] sm:$0xff] }
 0x273   :  { %2266 = vmatprep.subr.bf16.mxu0 %v2265_v7  ;;  %2390 = vmatprep.subr.bf16.mxu1 %v2389_v8  ;;  %v2283_v7 = vpack.c.bf16 %v893_v2, %v891_v63  ;;  %v2285_v31 = vpack.c.bf16 %v898_v19, %v896_v18  ;;  %v1483_v34 = vld [vmem:[#allocation14 + $0xf8] sm:$0xff]  ;;  %v2295_v2 = vpack.c.bf16 %v905_v56, %v903_v49  ;;  %v909_v9 = vld [vmem:[#allocation12 + $0x130] sm:$0xff]  ;;  %v1512_v18 = vld [vmem:[#allocation14 + $0x1e0] sm:$0xff] }
 0x274   :  { %2392 = vmatpush1.bf16.msra.mxu1 %v2391_v13  ;;  %v2297_v8 = vpack.c.bf16 %v910_v62, %v908_v61  ;;  %v1518_v11 = vld [vmem:[#allocation14 + $0x210] sm:$0xff]  ;;  %v914_v13 = vld [vmem:[#allocation12 + $0x158] sm:$0xff]  ;;  %v1517_v19 = vld [vmem:[#allocation14 + $0x208] sm:$0xff] }
 0x275   :  { %1106 = vmatmul.mubr.f32.gmra.mrb[6].mxu0 %v1020_v39  ;;  %2394 = vmatprep.subr.bf16.mxu1 %v2393_v14  ;;  %v2287_v39 = vpack.c.bf16 %v897_v33, %v895_v25  ;;  %v2413_v17 = vpack.c.bf16 %v1518_v11, %v1513_v10  ;;  %v1528_v25 = vld [vmem:[#allocation14 + $0x260] sm:$0xff]  ;;  %v1547_v61 = vld [vmem:[#allocation14 + $0x2f8] sm:$0xff] }
 0x276   :  { %2268 = vmatpush1.bf16.msra.mxu0 %v2267_v35  ;;  %v1488_v35 = vld [vmem:[#allocation14 + $0x120] sm:$0xff] }
 0x277   :  { %2270 = vmatprep.subr.bf16.mxu0 %v2269_v36  ;;  %v937_v43 = vld [vmem:[#allocation3 + $0x30] sm:$0x7]  ;;  %v900_v36 = vld [vmem:[#allocation12 + $0xe8] sm:$0xff] }
 0x278   :  { %v938_v45 = vld [vmem:[#allocation3 + $0x38] sm:$0x7]  ;;  %v1023_v48 = vrot.slane %v937_v43, 1  ;;  %v901_v43 = vld [vmem:[#allocation12 + $0xf0] sm:$0xff] }
 0x279   :  { %v1025_v50 = vrot.slane %v938_v45, 1  ;;  %v906_v45 = vld [vmem:[#allocation12 + $0x118] sm:$0xff]  ;;  %v2291_v24 = vpack.c.bf16 %v901_v43, %v899_v53  ;;  %v915_v33 = vld [vmem:[#allocation12 + $0x160] sm:$0xff]  ;;  %v1538_v53 = vld [vmem:[#allocation14 + $0x2b0] sm:$0xff] }
 0x27a   :  { %2272 = vmatpush1.bf16.msra.mxu0 %v2271_v42  ;;  %v1024_v60 = vsel %vm1012_vm1, %v1019_v29, %v1023_v48  ;;  %v1477_v29 = vld [vmem:[#allocation14 + $0xc8] sm:$0xff]  ;;  %v2289_v42 = vpack.c.bf16 %v902_v37, %v900_v36  ;;  %v1527_v36 = vld [vmem:[#allocation14 + $0x258] sm:$0xff]  ;;  %v919_v43 = vld [vmem:[#allocation12 + $0x180] sm:$0xff] }
 0x27b   :  { %v1026_v32 = vsel %vm1012_vm1, %v1021_v16, %v1025_v50  ;;  %2274 = vmatprep.subr.bf16.mxu0 %v2273_v44  ;;  %v1467_v16 = vld [vmem:[#allocation14 + $0x78] sm:$0xff]  ;;  %v2399_v38 = vpack.c.bf16 %v1477_v29, %v1472_v28  ;;  %v1493_v44 = vld [vmem:[#allocation14 + $0x148] sm:$0xff]  ;;  %v2415_v29 = vpack.c.bf16 %v1517_v19, %v1512_v18  ;;  %v1548_v49 = vld [vmem:[#allocation14 + $0x300] sm:$0xff] }
 0x27c   :  { %1111 = vmatprep.mubr.f32.mxu0 %v1026_v32  ;;  %v2395_v23 = vpack.c.bf16 %v1467_v16, %v1462_v15  ;;  %v1497_v32 = vld [vmem:[#allocation14 + $0x168] sm:$0xff]  ;;  %v2299_v15 = vpack.c.bf16 %v909_v9, %v907_v3  ;;  %v911_v16 = vld [vmem:[#allocation12 + $0x140] sm:$0xff]  ;;  %v918_v28 = vld [vmem:[#allocation12 + $0x178] sm:$0xff] }
 0x27d   :  { %1112 = vmatmul.mubr.f32.gmra.mrb[8].mxu0 %v1024_v60  ;;  %v1508_v60 = vld [vmem:[#allocation14 + $0x1c0] sm:$0xff]  ;;  %v1558_v3 = vld [vmem:[#allocation14 + $0x350] sm:$0xff]  ;;  %v934_v18 = vld [vmem:[#allocation12 + $0x1f8] sm:$0xff] }
 0x27e   :  { %1117 = vmatprep.mubr.f32.mxu0 %v1025_v50  ;;  %2276 = vmatpush1.bf16.msra.mxu0 %v2275_v52  ;;  %v2405_v50 = vpack.c.bf16 %v1498_v21, %v1493_v44  ;;  %v1492_v52 = vld [vmem:[#allocation14 + $0x140] sm:$0xff]  ;;  %v2409_v4 = vpack.c.bf16 %v1508_v60, %v1503_v57  ;;  %v1542_v60 = vld [vmem:[#allocation14 + $0x2d0] sm:$0xff] }
 0x27f   :  { %2278 = vmatprep.subr.bf16.mxu0 %v2277_v55  ;;  %2396 = vmatpush1.bf16.msra.mxu1 %v2395_v23  ;;  %v2293_v55 = vpack.c.bf16 %v906_v45, %v904_v27  ;;  %v2407_v63 = vpack.c.bf16 %v1497_v32, %v1492_v52  ;;  %v913_v23 = vld [vmem:[#allocation12 + $0x150] sm:$0xff]  ;;  %v1532_v21 = vld [vmem:[#allocation14 + $0x280] sm:$0xff]  ;;  %v1537_v27 = vld [vmem:[#allocation14 + $0x2a8] sm:$0xff] }
 0x280   :  { %2398 = vmatprep.subr.bf16.mxu1 %v2397_v26  ;;  %v916_v26 = vld [vmem:[#allocation12 + $0x168] sm:$0xff]  ;;  %v926_v52 = vld [vmem:[#allocation12 + $0x1b8] sm:$0xff]  ;;  %v2423_v32 = vpack.c.bf16 %v1537_v27, %v1532_v21  ;;  %v923_v56 = vld [vmem:[#allocation12 + $0x1a0] sm:$0xff] }
 0x281   :  { %1118 = vmatmul.mubr.f32.gmra.mrb[10].mxu0 %v1023_v48  ;;  %v2403_v48 = vpack.c.bf16 %v1487_v41, %v1482_v40  ;;  %v2305_v37 = vpack.c.bf16 %v918_v28, %v916_v26  ;;  %v922_v40 = vld [vmem:[#allocation12 + $0x198] sm:$0xff]  ;;  %v927_v9 = vld [vmem:[#allocation12 + $0x1c0] sm:$0xff] }
 0x282   :  { %1188 = vmatprep.mubr.f32.mxu0 %v848_v30  ;;  %2280 = vmatpush1.bf16.msra.mxu0 %v2279_v6  ;;  %v2401_v30 = vpack.c.bf16 %v1488_v35, %v1483_v34  ;;  %v1507_v6 = vld [vmem:[#allocation14 + $0x1b8] sm:$0xff]  ;;  %v1522_v35 = vld [vmem:[#allocation14 + $0x230] sm:$0xff]  ;;  %v1552_v11 = vld [vmem:[#allocation14 + $0x320] sm:$0xff] }
 0x283   :  { %2282 = vmatprep.subr.bf16.mxu0 %v2281_v12  ;;  %2400 = vmatpush1.bf16.msra.mxu1 %v2399_v38  ;;  %v912_v12 = vld [vmem:[#allocation12 + $0x148] sm:$0xff]  ;;  %v2411_v14 = vpack.c.bf16 %v1507_v6, %v1502_v5  ;;  %v917_v38 = vld [vmem:[#allocation12 + $0x170] sm:$0xff]  ;;  %v2419_v41 = vpack.c.bf16 %v1527_v36, %v1522_v35  ;;  %v930_v5 = vld [vmem:[#allocation12 + $0x1d8] sm:$0xff]  ;;  %v2427_v6 = vpack.c.bf16 %v1547_v61, %v1542_v60 }
 0x284   :  { %2402 = vmatprep.subr.bf16.mxu1 %v2401_v30  ;;  %v2301_v22 = vpack.c.bf16 %v914_v13, %v912_v12  ;;  %v920_v30 = vld [vmem:[#allocation12 + $0x188] sm:$0xff]  ;;  %v1567_v26 = vld [vmem:[#allocation14 + $0x398] sm:$0xff] }
 0x285   :  { %v2309_v45 = vpack.c.bf16 %v922_v40, %v920_v30  ;;  %v1557_v12 = vld [vmem:[#allocation14 + $0x348] sm:$0xff]  ;;  %v1221_v35 = vld [vmem:[#allocation12 + $0x418] sm:$0xff]  ;;  %v1218_v40 = vld [vmem:[#allocation12 + $0x400] sm:$0xff] }
 0x286   :  { %2284 = vmatpush1.bf16.msra.mxu0 %v2283_v7  ;;  %v1523_v7 = vld [vmem:[#allocation14 + $0x238] sm:$0xff]  ;;  %v2431_v19 = vpack.c.bf16 %v1557_v12, %v1552_v11  ;;  %v1239_v12 = vld [vmem:[#allocation12 + $0x4a8] sm:$0xff] }
 0x287   :  { %2286 = vmatprep.subr.bf16.mxu0 %v2285_v31  ;;  %2404 = vmatpush1.bf16.msra.mxu1 %v2403_v48  ;;  %v2303_v31 = vpack.c.bf16 %v913_v23, %v911_v16  ;;  %v2417_v34 = vpack.c.bf16 %v1528_v25, %v1523_v7  ;;  %v921_v48 = vld [vmem:[#allocation12 + $0x190] sm:$0xff]  ;;  %v1568_v16 = vld [vmem:[#allocation14 + $0x3a0] sm:$0xff]  ;;  %v1214_v61 = vld [vmem:[#allocation3 + $0x8] sm:$0xfc] }
 0x288   :  { %2406 = vmatprep.subr.bf16.mxu1 %v2405_v50  ;;  %v924_v50 = vld [vmem:[#allocation12 + $0x1a8] sm:$0xff]  ;;  %v931_v23 = vld [vmem:[#allocation12 + $0x1e0] sm:$0xff]  ;;  %v1562_v25 = vld [vmem:[#allocation14 + $0x370] sm:$0xff] }
 0x289   :  { %v2313_v62 = vpack.c.bf16 %v926_v52, %v924_v50  ;;  %v2435_v36 = vpack.c.bf16 %v1567_v26, %v1562_v25  ;;  %v869_v11 = vld [vmem:[#allocation3 + $0x30] sm:$0x3]  ;;  %v1242_v25 = vld [vmem:[#allocation12 + $0x4c0] sm:$0xff]  ;;  %v1244_v26 = vld [vmem:[#allocation12 + $0x4d0] sm:$0xff] }
 0x28a   :  { %2288 = vmatpush1.bf16.msra.mxu0 %v2287_v39  ;;  %v1533_v39 = vld [vmem:[#allocation14 + $0x288] sm:$0xff] }
 0x28b   :  { %2290 = vmatprep.subr.bf16.mxu0 %v2289_v42  ;;  %2408 = vmatpush1.bf16.msra.mxu1 %v2407_v63  ;;  %v2307_v42 = vpack.c.bf16 %v917_v38, %v915_v33  ;;  %v2421_v44 = vpack.c.bf16 %v1538_v53, %v1533_v39  ;;  %v925_v63 = vld [vmem:[#allocation12 + $0x1b0] sm:$0xff]  ;;  %v1572_v39 = vld [vmem:[#allocation14 + $0x3c0] sm:$0xff]  ;;  %v1577_v53 = vld [vmem:[#allocation14 + $0x3e8] sm:$0xff] }
 0x28c   :  { %2410 = vmatprep.subr.bf16.mxu1 %v2409_v4  ;;  %v928_v4 = vld [vmem:[#allocation12 + $0x1c8] sm:$0xff]  ;;  %v1578_v33 = vld [vmem:[#allocation14 + $0x3f0] sm:$0xff] }
 0x28d   :  { %v2317_v13 = vpack.c.bf16 %v930_v5, %v928_v4  ;;  %v1290_v4 = vrot.slane %v1214_v61, 2  ;;  %v1267_v61 = vld [vmem:[#allocation12 + $0x588] sm:$0xff] }
 0x28e   :  { %2292 = vmatpush1.bf16.msra.mxu0 %v2291_v24  ;;  %v1543_v24 = vld [vmem:[#allocation14 + $0x2d8] sm:$0xff] }
 0x28f   :  { %2294 = vmatprep.subr.bf16.mxu0 %v2293_v55  ;;  %2412 = vmatpush1.bf16.msra.mxu1 %v2411_v14  ;;  %v2311_v55 = vpack.c.bf16 %v921_v48, %v919_v43  ;;  %v2425_v57 = vpack.c.bf16 %v1548_v49, %v1543_v24  ;;  %v929_v14 = vld [vmem:[#allocation12 + $0x1d0] sm:$0xff]  ;;  %v1225_v43 = vld [vmem:[#allocation12 + $0x438] sm:$0xff]  ;;  %v1227_v24 = vld [vmem:[#allocation12 + $0x448] sm:$0xff] }
 0x290   :  { %2414 = vmatprep.subr.bf16.mxu1 %v2413_v17  ;;  %v932_v17 = vld [vmem:[#allocation12 + $0x1e8] sm:$0xff]  ;;  %v1224_v48 = vld [vmem:[#allocation12 + $0x430] sm:$0xff]  ;;  %v1229_v49 = vld [vmem:[#allocation12 + $0x458] sm:$0xff] }
 0x291   :  { %v2321_v28 = vpack.c.bf16 %v934_v18, %v932_v17  ;;  %v2333_v52 = vpack.c.bf16 %v1229_v49, %v1227_v24  ;;  %v1238_v17 = vld [vmem:[#allocation12 + $0x4a0] sm:$0xff]  ;;  %v1240_v18 = vld [vmem:[#allocation12 + $0x4b0] sm:$0xff] }
 0x292   :  { %2296 = vmatpush1.bf16.msra.mxu0 %v2295_v2  ;;  %v1553_v2 = vld [vmem:[#allocation14 + $0x328] sm:$0xff]  ;;  %v1258_v49 = vld [vmem:[#allocation12 + $0x540] sm:$0xff] }
 0x293   :  { %2298 = vmatprep.subr.bf16.mxu0 %v2297_v8  ;;  %2416 = vmatpush1.bf16.msra.mxu1 %v2415_v29  ;;  %v2315_v8 = vpack.c.bf16 %v925_v63, %v923_v56  ;;  %v2429_v10 = vpack.c.bf16 %v1558_v3, %v1553_v2  ;;  %v933_v29 = vld [vmem:[#allocation12 + $0x1f0] sm:$0xff]  ;;  %v1231_v56 = vld [vmem:[#allocation12 + $0x468] sm:$0xff]  ;;  %v1237_v2 = vld [vmem:[#allocation12 + $0x498] sm:$0xff] }
 0x294   :  { %2418 = vmatprep.subr.bf16.mxu1 %v2417_v34  ;;  %v1219_v34 = vld [vmem:[#allocation12 + $0x408] sm:$0xff]  ;;  %v870_v3 = vld [vmem:[#allocation3 + $0x38] sm:$0x3] }
 0x295   :  { %v2325_v30 = vpack.c.bf16 %v1221_v35, %v1219_v34  ;;  %v1235_v63 = vld [vmem:[#allocation12 + $0x488] sm:$0xff]  ;;  %v1246_v34 = vld [vmem:[#allocation12 + $0x4e0] sm:$0xff]  ;;  %v1248_v35 = vld [vmem:[#allocation12 + $0x4f0] sm:$0xff] }
 0x296   :  { %2300 = vmatpush1.bf16.msra.mxu0 %v2299_v15  ;;  %v1563_v15 = vld [vmem:[#allocation14 + $0x378] sm:$0xff] }
 0x297   :  { %2302 = vmatprep.subr.bf16.mxu0 %v2301_v22  ;;  %2420 = vmatpush1.bf16.msra.mxu1 %v2419_v41  ;;  %v2319_v22 = vpack.c.bf16 %v929_v14, %v927_v9  ;;  %v2433_v7 = vpack.c.bf16 %v1568_v16, %v1563_v15  ;;  %v1220_v41 = vld [vmem:[#allocation12 + $0x410] sm:$0xff]  ;;  %v1234_v9 = vld [vmem:[#allocation12 + $0x480] sm:$0xff] }
 0x298   :  { %2422 = vmatprep.subr.bf16.mxu1 %v2421_v44  ;;  %v2439_v44 = vpack.c.bf16 %v1577_v53, %v1572_v39  ;;  %v2327_v21 = vpack.c.bf16 %v1220_v41, %v1218_v40  ;;  %v1250_v53 = vld [vmem:[#allocation12 + $0x500] sm:$0xff]  ;;  %v1255_v40 = vld [vmem:[#allocation12 + $0x528] sm:$0xff]  ;;  %v1257_v41 = vld [vmem:[#allocation12 + $0x538] sm:$0xff] }
 0x29a   :  { %2304 = vmatpush1.bf16.msra.mxu0 %v2303_v31  ;;  %v1573_v31 = vld [vmem:[#allocation14 + $0x3c8] sm:$0xff] }
 0x29b   :  { %2306 = vmatprep.subr.bf16.mxu0 %v2305_v37  ;;  %2424 = vmatpush1.bf16.msra.mxu1 %v2423_v32  ;;  %v2323_v37 = vpack.c.bf16 %v933_v29, %v931_v23  ;;  %v2437_v38 = vpack.c.bf16 %v1578_v33, %v1573_v31  ;;  %v1226_v32 = vld [vmem:[#allocation12 + $0x440] sm:$0xff]  ;;  %v2347_v23 = vpack.c.bf16 %v1240_v18, %v1238_v17  ;;  %v1249_v29 = vld [vmem:[#allocation12 + $0x4f8] sm:$0xff]  ;;  %v1279_v17 = vld [vmem:[#allocation12 + $0x5e8] sm:$0xff] }
 0x29c   :  { %2426 = vmatprep.subr.bf16.mxu1 %v2425_v57  ;;  %v1233_v57 = vld [vmem:[#allocation12 + $0x478] sm:$0xff]  ;;  %v2351_v31 = vpack.c.bf16 %v1244_v26, %v1242_v25  ;;  %v1536_v25 = vld [vmem:[#allocation14 + $0x2a0] sm:$0xff]  ;;  %v1541_v26 = vld [vmem:[#allocation14 + $0x2c8] sm:$0xff] }
 0x29d   :  { %v2337_v51 = vpack.c.bf16 %v1233_v57, %v1231_v56  ;;  %v1262_v57 = vld [vmem:[#allocation12 + $0x560] sm:$0xff]  ;;  %v1281_v18 = vld [vmem:[#allocation12 + $0x5f8] sm:$0xff] }
 0x29e   :  { %2308 = vmatpush1.bf16.msra.mxu0 %v2307_v42  ;;  %v1223_v42 = vld [vmem:[#allocation12 + $0x428] sm:$0xff] }
 0x29f   :  { %2310 = vmatprep.subr.bf16.mxu0 %v2309_v45  ;;  %2428 = vmatpush1.bf16.msra.mxu1 %v2427_v6  ;;  %v2329_v27 = vpack.c.bf16 %v1225_v43, %v1223_v42  ;;  %v1222_v45 = vld [vmem:[#allocation12 + $0x420] sm:$0xff]  ;;  %v1291_v6 = vrot.slane %v2936_v59, 2  ;;  %v2361_v43 = vpack.c.bf16 %v1257_v41, %v1255_v40  ;;  %v1466_v41 = vld [vmem:[#allocation14 + $0x70] sm:$0xff] }
 0x2a0   :  { %2430 = vmatprep.subr.bf16.mxu1 %v2429_v10  ;;  %v2331_v50 = vpack.c.bf16 %v1224_v48, %v1222_v45  ;;  %v1236_v10 = vld [vmem:[#allocation12 + $0x490] sm:$0xff]  ;;  %v1261_v45 = vld [vmem:[#allocation12 + $0x558] sm:$0xff] }
 0x2a1   :  { %v1292_v14 = vsel %vm1286_vm2, %v1290_v4, %v1291_v6  ;;  %v2343_v15 = vpack.c.bf16 %v1236_v10, %v1234_v9  ;;  %v1273_v4 = vld [vmem:[#allocation12 + $0x5b8] sm:$0xff]  ;;  %v1270_v9 = vld [vmem:[#allocation12 + $0x5a0] sm:$0xff]  ;;  %v1272_v10 = vld [vmem:[#allocation12 + $0x5b0] sm:$0xff] }
 0x2a2   :  { %2312 = vmatpush1.bf16.msra.mxu0 %v2311_v55  ;;  %v1228_v55 = vld [vmem:[#allocation12 + $0x450] sm:$0xff] }
 0x2a3   :  { %2314 = vmatprep.subr.bf16.mxu0 %v2313_v62  ;;  %2432 = vmatpush1.bf16.msra.mxu1 %v2431_v19  ;;  %v2335_v60 = vpack.c.bf16 %v1228_v55, %v1226_v32  ;;  %v1232_v62 = vld [vmem:[#allocation12 + $0x470] sm:$0xff]  ;;  %v1243_v19 = vld [vmem:[#allocation12 + $0x4c8] sm:$0xff]  ;;  %v1265_v32 = vld [vmem:[#allocation12 + $0x578] sm:$0xff] }
 0x2a4   :  { %2434 = vmatprep.subr.bf16.mxu1 %v2433_v7 }
 0x2a6   :  { %2316 = vmatpush1.bf16.msra.mxu0 %v2315_v8  ;;  %v2341_v8 = vpack.c.bf16 %v1237_v2, %v1235_v63  ;;  %v1266_v63 = vld [vmem:[#allocation12 + $0x580] sm:$0xff]  ;;  %v1268_v2 = vld [vmem:[#allocation12 + $0x590] sm:$0xff] }
 0x2a7   :  { %2318 = vmatprep.subr.bf16.mxu0 %v2317_v13  ;;  %2436 = vmatpush1.bf16.msra.mxu1 %v2435_v36  ;;  %v1241_v13 = vld [vmem:[#allocation12 + $0x4b8] sm:$0xff]  ;;  %v1251_v36 = vld [vmem:[#allocation12 + $0x508] sm:$0xff] }
 0x2a8   :  { %2438 = vmatprep.subr.bf16.mxu1 %v2437_v38  ;;  %v2345_v16 = vpack.c.bf16 %v1241_v13, %v1239_v12  ;;  %v2355_v38 = vpack.c.bf16 %v1248_v35, %v1246_v34  ;;  %v1277_v12 = vld [vmem:[#allocation12 + $0x5d8] sm:$0xff]  ;;  %v2379_v13 = vpack.c.bf16 %v1272_v10, %v1270_v9  ;;  %v1461_v34 = vld [vmem:[#allocation14 + $0x48] sm:$0xff]  ;;  %v1582_v10 = vld [vmem:[#allocation14 + $0x410] sm:$0xff] }
 0x2aa   :  { %2320 = vmatpush1.bf16.msra.mxu0 %v2319_v22  ;;  %v1245_v22 = vld [vmem:[#allocation12 + $0x4d8] sm:$0xff] }
 0x2ab   :  { %2322 = vmatprep.subr.bf16.mxu0 %v2321_v28  ;;  %2440 = vmatpush1.bf16.msra.mxu1 %v2439_v44  ;;  %v2349_v7 = vpack.c.bf16 %v1245_v22, %v1243_v19  ;;  %v1247_v28 = vld [vmem:[#allocation12 + $0x4e8] sm:$0xff]  ;;  %v1254_v44 = vld [vmem:[#allocation12 + $0x520] sm:$0xff]  ;;  %v2385_v22 = vpack.c.bf16 %v1281_v18, %v1279_v17 }
 0x2ac   :  { %v2353_v33 = vpack.c.bf16 %v1249_v29, %v1247_v28  ;;  %v1213_v28 = vld [vmem:[#allocation3] sm:$0xfc] }
 0x2ad   :  { %v1287_v35 = vrot.slane %v1213_v28, 2 }
 0x2ae   :  { %2324 = vmatpush1.bf16.msra.mxu0 %v2323_v37  ;;  %v1253_v37 = vld [vmem:[#allocation12 + $0x518] sm:$0xff] }
 0x2af   :  { %2326 = vmatprep.subr.bf16.mxu0 %v2325_v30  ;;  %v2357_v39 = vpack.c.bf16 %v1253_v37, %v1251_v36  ;;  %v1252_v30 = vld [vmem:[#allocation12 + $0x510] sm:$0xff]  ;;  %v1551_v37 = vld [vmem:[#allocation14 + $0x318] sm:$0xff] }
 0x2b0   :  { %v2359_v42 = vpack.c.bf16 %v1252_v30, %v1250_v53  ;;  %v1546_v36 = vld [vmem:[#allocation14 + $0x2f0] sm:$0xff]  ;;  %v1216_v53 = vld [vmem:[#allocation3 + $0x38] sm:$0xf] }
 0x2b1   :  { %1189 = vmatmul.mubr.f32.vlgmr.msra.gmra.mrb[4].mxu0 %v847_v54  ;;  %v1230_v54 = vld [vmem:[#allocation12 + $0x460] sm:$0xff]  ;;  %v2521_v40 = vpack.c.bf16 %v1551_v37, %v1546_v36  ;;  %v1603_v36 = vld [vmem:[#allocation14 + $0x4b8] sm:$0xff] }
 0x2b2   :  { %1194 = vmatprep.mubr.f32.mxu0 %v2936_v59  ;;  %2328 = vmatpush1.bf16.msra.mxu0 %v2327_v21  ;;  %v2339_v5 = vpack.c.bf16 %v1232_v62, %v1230_v54  ;;  %v1256_v21 = vld [vmem:[#allocation12 + $0x530] sm:$0xff]  ;;  %v1608_v37 = vld [vmem:[#allocation14 + $0x4e0] sm:$0xff] }
 0x2b3   :  { %2330 = vmatprep.subr.bf16.mxu0 %v2329_v27  ;;  %v1259_v27 = vld [vmem:[#allocation12 + $0x548] sm:$0xff]  ;;  %v2363_v48 = vpack.c.bf16 %v1256_v21, %v1254_v44  ;;  %v1293_v44 = vrot.slane %v2938_v0, 2  ;;  %v1556_v21 = vld [vmem:[#allocation14 + $0x340] sm:$0xff] }
 0x2b4   :  { %v2365_v24 = vpack.c.bf16 %v1261_v45, %v1259_v27  ;;  %v1561_v27 = vld [vmem:[#allocation14 + $0x368] sm:$0xff]  ;;  %v1299_v45 = vrot.slane %v1216_v53, 2  ;;  %v1607_v53 = vld [vmem:[#allocation14 + $0x4d8] sm:$0xff] }
 0x2b5   :  { %1195 = vmatmul.mubr.f32.gmra.mrb[6].mxu0 %v2934_v58 }
 0x2b6   :  { %1200 = vmatprep.mubr.f32.mxu0 %v2940_v1  ;;  %2332 = vmatpush1.bf16.msra.mxu0 %v2331_v50  ;;  %v1260_v50 = vld [vmem:[#allocation12 + $0x550] sm:$0xff] }
 0x2b7   :  { %2334 = vmatprep.subr.bf16.mxu0 %v2333_v52  ;;  %v1263_v52 = vld [vmem:[#allocation12 + $0x568] sm:$0xff]  ;;  %v2367_v55 = vpack.c.bf16 %v1260_v50, %v1258_v49  ;;  %v1476_v49 = vld [vmem:[#allocation14 + $0xc0] sm:$0xff] }
 0x2b8   :  { %v2369_v56 = vpack.c.bf16 %v1265_v32, %v1263_v52  ;;  %v1481_v50 = vld [vmem:[#allocation14 + $0xe8] sm:$0xff] }
 0x2b9   :  { %1201 = vmatmul.mubr.f32.gmra.mrb[8].mxu0 %v2938_v0  ;;  %v1566_v0 = vld [vmem:[#allocation14 + $0x390] sm:$0xff]  ;;  %v2527_v59 = vpack.c.bf16 %v1481_v50, %v1476_v49 }
 0x2ba   :  { %1206 = vmatprep.mubr.f32.mxu0 %v870_v3  ;;  %2336 = vmatpush1.bf16.msra.mxu0 %v2335_v60  ;;  %v1264_v60 = vld [vmem:[#allocation12 + $0x570] sm:$0xff]  ;;  %v1271_v3 = vld [vmem:[#allocation12 + $0x5a8] sm:$0xff] }
 0x2bb   :  { %2338 = vmatprep.subr.bf16.mxu0 %v2337_v51  ;;  %v1269_v51 = vld [vmem:[#allocation12 + $0x598] sm:$0xff]  ;;  %v2371_v54 = vpack.c.bf16 %v1264_v60, %v1262_v57  ;;  %v1486_v57 = vld [vmem:[#allocation14 + $0x110] sm:$0xff] }
 0x2bc   :  { %v2373_v62 = vpack.c.bf16 %v1269_v51, %v1267_v61  ;;  %v1491_v60 = vld [vmem:[#allocation14 + $0x138] sm:$0xff]  ;;  %v1576_v51 = vld [vmem:[#allocation14 + $0x3e0] sm:$0xff] }
 0x2bd   :  { %1207 = vmatmul.mubr.f32.gmra.mrb[10].mxu0 %v869_v11  ;;  %v1275_v11 = vld [vmem:[#allocation12 + $0x5c8] sm:$0xff] }
 0x2be   :  { %2340 = vmatpush1.bf16.msra.mxu0 %v2339_v5  ;;  %1373 = vmatprep.mubr.f32.mxu0 %v1292_v14  ;;  %v2375_v5 = vpack.c.bf16 %v1268_v2, %v1266_v63  ;;  %v2381_v14 = vpack.c.bf16 %v1277_v12, %v1275_v11  ;;  %v1496_v2 = vld [vmem:[#allocation14 + $0x160] sm:$0xff]  ;;  %v1587_v11 = vld [vmem:[#allocation14 + $0x438] sm:$0xff]  ;;  %v1586_v12 = vld [vmem:[#allocation14 + $0x430] sm:$0xff] }
 0x2bf   :  { %2342 = vmatprep.subr.bf16.mxu0 %v2341_v8  ;;  %v2377_v8 = vpack.c.bf16 %v1273_v4, %v1271_v3  ;;  %v1501_v3 = vld [vmem:[#allocation14 + $0x188] sm:$0xff] }
 0x2c0   :  { %v2535_v4 = vpack.c.bf16 %v1501_v3, %v1496_v2  ;;  %v1480_v2 = vld [vmem:[#allocation14 + $0xe0] sm:$0xff] }
 0x2c2   :  { %2344 = vmatpush1.bf16.msra.mxu0 %v2343_v15  ;;  %v1274_v15 = vld [vmem:[#allocation12 + $0x5c0] sm:$0xff] }
 0x2c3   :  { %2346 = vmatprep.subr.bf16.mxu0 %v2345_v16  ;;  %v1276_v16 = vld [vmem:[#allocation12 + $0x5d0] sm:$0xff] }
 0x2c4   :  { %v2383_v19 = vpack.c.bf16 %v1276_v16, %v1274_v15  ;;  %v1506_v15 = vld [vmem:[#allocation14 + $0x1b0] sm:$0xff]  ;;  %v1511_v16 = vld [vmem:[#allocation14 + $0x1d8] sm:$0xff] }
 0x2c5   :  { %v2539_v18 = vpack.c.bf16 %v1511_v16, %v1506_v15  ;;  %v1485_v15 = vld [vmem:[#allocation14 + $0x108] sm:$0xff]  ;;  %v1490_v16 = vld [vmem:[#allocation14 + $0x130] sm:$0xff] }
 0x2c6   :  { %2348 = vmatpush1.bf16.msra.mxu0 %v2347_v23  ;;  %v1278_v23 = vld [vmem:[#allocation12 + $0x5e0] sm:$0xff] }
 0x2c7   :  { %2350 = vmatprep.subr.bf16.mxu0 %v2349_v7  ;;  %v1280_v7 = vld [vmem:[#allocation12 + $0x5f0] sm:$0xff] }
 0x2c8   :  { %v2387_v29 = vpack.c.bf16 %v1280_v7, %v1278_v23  ;;  %v1592_v7 = vld [vmem:[#allocation14 + $0x460] sm:$0xff] }
 0x2ca   :  { %2352 = vmatpush1.bf16.msra.mxu0 %v2351_v31  ;;  %v2517_v31 = vpack.c.bf16 %v1541_v26, %v1536_v25  ;;  %v1597_v25 = vld [vmem:[#allocation14 + $0x488] sm:$0xff]  ;;  %v1596_v26 = vld [vmem:[#allocation14 + $0x480] sm:$0xff] }
 0x2cb   :  { %2354 = vmatprep.subr.bf16.mxu0 %v2353_v33  ;;  %v1456_v33 = vld [vmem:[#allocation14 + $0x20] sm:$0xff]  ;;  %v2447_v28 = vpack.c.bf16 %v1597_v25, %v1592_v7  ;;  %v2465_v25 = vpack.c.bf16 %v1490_v16, %v1485_v15 }
 0x2cc   :  { %v2519_v30 = vpack.c.bf16 %v1461_v34, %v1456_v33  ;;  %v1521_v34 = vld [vmem:[#allocation14 + $0x228] sm:$0xff]  ;;  %v1564_v16 = vld [vmem:[#allocation14 + $0x380] sm:$0xff] }
 0x2ce   :  { %2356 = vmatpush1.bf16.msra.mxu0 %v2355_v38  ;;  %v1295_v38 = vrot.slane %v2940_v1, 2 }
 0x2cf   :  { %2358 = vmatprep.subr.bf16.mxu0 %v2357_v39  ;;  %v1288_v39 = vrot.slane %v2934_v58, 2 }
 0x2d0   :  { %v1296_v1 = vsel %vm1286_vm2, %v1291_v6, %v1295_v38 }
 0x2d1   :  { %v1294_v52 = vsel %vm1286_vm2, %v1288_v39, %v1293_v44 }
 0x2d2   :  { %2360 = vmatpush1.bf16.msra.mxu0 %v2359_v42  ;;  %v1471_v42 = vld [vmem:[#allocation14 + $0x98] sm:$0xff] }
 0x2d3   :  { %2362 = vmatprep.subr.bf16.mxu0 %v2361_v43  ;;  %v1289_v43 = vsel %vm1286_vm2, %v1287_v35, %v1288_v39  ;;  %v2523_v58 = vpack.c.bf16 %v1471_v42, %v1466_v41  ;;  %v1602_v39 = vld [vmem:[#allocation14 + $0x4b0] sm:$0xff]  ;;  %v1611_v41 = vld [vmem:[#allocation14 + $0x4f8] sm:$0xff] }
 0x2d4   :  { %v1526_v42 = vld [vmem:[#allocation14 + $0x250] sm:$0xff] }
 0x2d6   :  { %2364 = vmatpush1.bf16.msra.mxu0 %v2363_v48  ;;  %v1215_v48 = vld [vmem:[#allocation3 + $0x30] sm:$0xf] }
 0x2d7   :  { %2366 = vmatprep.subr.bf16.mxu0 %v2365_v24  ;;  %v2525_v24 = vpack.c.bf16 %v1561_v27, %v1556_v21  ;;  %v1297_v32 = vrot.slane %v1215_v48, 2  ;;  %v1455_v27 = vld [vmem:[#allocation14 + $0x18] sm:$0xff]  ;;  %v1406_v48 = vld [vmem:[%s3049_s6] sm:$0x3]  ;;  %s2730_s6 = smov 64  }
 0x2d9   :  { %v1298_v61 = vsel %vm1286_vm2, %v1293_v44, %v1297_v32 }
 0x2da   :  { %2368 = vmatpush1.bf16.msra.mxu0 %v2367_v55  ;;  %v1571_v55 = vld [vmem:[#allocation14 + $0x3b8] sm:$0xff] }
 0x2db   :  { %2370 = vmatprep.subr.bf16.mxu0 %v2369_v56  ;;  %v1300_v56 = vsel %vm1286_vm2, %v1295_v38, %v1299_v45  ;;  %v2529_v6 = vpack.c.bf16 %v1571_v55, %v1566_v0  ;;  %v2449_v38 = vpack.c.bf16 %v1608_v37, %v1603_v36  ;;  %v1459_v0 = vld [vmem:[#allocation14 + $0x38] sm:$0xff] }
 0x2de   :  { %2372 = vmatpush1.bf16.msra.mxu0 %v2371_v54  ;;  %v1581_v54 = vld [vmem:[#allocation14 + $0x408] sm:$0xff] }
 0x2df   :  { %2374 = vmatprep.subr.bf16.mxu0 %v2373_v62  ;;  %v2531_v62 = vpack.c.bf16 %v1491_v60, %v1486_v57  ;;  %v2533_v63 = vpack.c.bf16 %v1581_v54, %v1576_v51 }
 0x2e2   :  { %2376 = vmatpush1.bf16.msra.mxu0 %v2375_v5  ;;  %v1583_v5 = vld [vmem:[#allocation14 + $0x418] sm:$0xff] }
 0x2e3   :  { %2378 = vmatprep.subr.bf16.mxu0 %v2377_v8  ;;  %v1588_v8 = vld [vmem:[#allocation14 + $0x440] sm:$0xff] }
 0x2e4   :  { %v2441_v9 = vpack.c.bf16 %v1588_v8, %v1583_v5 }
 0x2e6   :  { %2380 = vmatpush1.bf16.msra.mxu0 %v2379_v13  ;;  %v2443_v13 = vpack.c.bf16 %v1587_v11, %v1582_v10  ;;  %2442 = vmatprep.subr.bf16.mxu1 %v2441_v9 }
 0x2e7   :  { %2382 = vmatprep.subr.bf16.mxu0 %v2381_v14  ;;  %v1591_v14 = vld [vmem:[#allocation14 + $0x458] sm:$0xff] }
 0x2e8   :  { %v2537_v17 = vpack.c.bf16 %v1591_v14, %v1586_v12  ;;  %2444 = vmatpush1.bf16.msra.mxu1 %v2443_v13  ;;  %v1474_v12 = vld [vmem:[#allocation14 + $0xb0] sm:$0xff]  ;;  %v1479_v13 = vld [vmem:[#allocation14 + $0xd8] sm:$0xff] }
 0x2ea   :  { %2384 = vmatpush1.bf16.msra.mxu0 %v2383_v19  ;;  %v1593_v19 = vld [vmem:[#allocation14 + $0x468] sm:$0xff] }
 0x2eb   :  { %2386 = vmatprep.subr.bf16.mxu0 %v2385_v22  ;;  %v1598_v22 = vld [vmem:[#allocation14 + $0x490] sm:$0xff] }
 0x2ec   :  { %v2445_v23 = vpack.c.bf16 %v1598_v22, %v1593_v19  ;;  %v2463_v22 = vpack.c.bf16 %v1479_v13, %v1474_v12  ;;  %v1565_v12 = vld [vmem:[#allocation14 + $0x388] sm:$0xff]  ;;  %v1570_v13 = vld [vmem:[#allocation14 + $0x3b0] sm:$0xff] }
 0x2ed   :  { %v2497_v15 = vpack.c.bf16 %v1570_v13, %v1565_v12 }
 0x2ee   :  { %2388 = vmatpush1.bf16.msra.mxu0 %v2387_v29  ;;  %v1601_v29 = vld [vmem:[#allocation14 + $0x4a8] sm:$0xff]  ;;  %2446 = vmatprep.subr.bf16.mxu1 %v2445_v23 }
 0x2ef   :  { %2518 = vmatprep.subr.bf16.mxu0 %v2517_v31  ;;  %v1516_v31 = vld [vmem:[#allocation14 + $0x200] sm:$0xff]  ;;  %v2541_v33 = vpack.c.bf16 %v1601_v29, %v1596_v26  ;;  %2448 = vmatpush1.bf16.msra.mxu1 %v2447_v28  ;;  %v1489_v28 = vld [vmem:[#allocation14 + $0x128] sm:$0xff] }
 0x2f0   :  { %v2543_v35 = vpack.c.bf16 %v1521_v34, %v1516_v31  ;;  %2450 = vmatprep.subr.bf16.mxu1 %v2449_v38  ;;  %v1484_v26 = vld [vmem:[#allocation14 + $0x100] sm:$0xff]  ;;  %v1495_v31 = vld [vmem:[#allocation14 + $0x158] sm:$0xff]  ;;  %v1494_v38 = vld [vmem:[#allocation14 + $0x150] sm:$0xff] }
 0x2f1   :  { %1374 = vmatmul.mubr.f32.vlgmr.msra.gmra.mrb[4].mxu0 %v1289_v43  ;;  %v1531_v43 = vld [vmem:[#allocation14 + $0x278] sm:$0xff]  ;;  %v2467_v36 = vpack.c.bf16 %v1489_v28, %v1484_v26  ;;  %v1574_v26 = vld [vmem:[#allocation14 + $0x3d0] sm:$0xff] }
 0x2f2   :  { %1379 = vmatprep.mubr.f32.mxu0 %v1296_v1  ;;  %2520 = vmatpush3.bf16.msra.mxu0 %v2519_v30  ;;  %v1606_v30 = vld [vmem:[#allocation14 + $0x4d0] sm:$0xff]  ;;  %v2547_v21 = vpack.c.bf16 %v1531_v43, %v1526_v42  ;;  %v1460_v1 = vld [vmem:[#allocation14 + $0x40] sm:$0xff]  ;;  %v1509_v43 = vld [vmem:[#allocation14 + $0x1c8] sm:$0xff] }
 0x2f3   :  { %2522 = vmatprep.subr.bf16.mxu0 %v2521_v40  ;;  %v2451_v40 = vpack.c.bf16 %v1607_v53, %v1602_v39  ;;  %v2545_v44 = vpack.c.bf16 %v1611_v41, %v1606_v30  ;;  %v1499_v39 = vld [vmem:[#allocation14 + $0x178] sm:$0xff]  ;;  %v1505_v53 = vld [vmem:[#allocation14 + $0x1a8] sm:$0xff]  ;;  %v1510_v30 = vld [vmem:[#allocation14 + $0x1d0] sm:$0xff] }
 0x2f4   :  { %v2473_v41 = vpack.c.bf16 %v1510_v30, %v1505_v53  ;;  %v1504_v42 = vld [vmem:[#allocation14 + $0x1a0] sm:$0xff]  ;;  %v1579_v28 = vld [vmem:[#allocation14 + $0x3f8] sm:$0xff]  ;;  %v1594_v30 = vld [vmem:[#allocation14 + $0x470] sm:$0xff] }
 0x2f5   :  { %1380 = vmatmul.mubr.f32.gmra.mrb[6].mxu0 %v1294_v52  ;;  %2452 = vmatpush1.bf16.msra.mxu1 %v2451_v40  ;;  %v2471_v40 = vpack.c.bf16 %v1499_v39, %v1494_v38  ;;  %v1600_v38 = vld [vmem:[#allocation14 + $0x4a0] sm:$0xff] }
 0x2f6   :  { %1385 = vmatprep.mubr.f32.mxu0 %v1300_v56  ;;  %2524 = vmatpush3.bf16.msra.mxu0 %v2523_v58  ;;  %v1411_v58 = vrot.slane %v1406_v48, %v831_v47  ;;  %v1465_v56 = vld [vmem:[#allocation14 + $0x68] sm:$0xff] }
 0x2f7   :  { %2526 = vmatprep.subr.bf16.mxu0 %v2525_v24  ;;  %v1415_v24 = vrot.slane %v1406_v48, %v835_v20  ;;  %v1514_v48 = vld [vmem:[#allocation14 + $0x1f0] sm:$0xff] }
 0x2f9   :  { %1386 = vmatmul.mubr.f32.gmra.mrb[8].mxu0 %v1298_v61 }
 0x2fa   :  { %1391 = vmatprep.mubr.f32.mxu0 %v1299_v45  ;;  %2528 = vmatpush3.bf16.msra.mxu0 %v2527_v59  ;;  %v2453_v45 = vpack.c.bf16 %v1460_v1, %v1455_v27  ;;  %v1470_v59 = vld [vmem:[#allocation14 + $0x90] sm:$0xff]  ;;  %v2475_v27 = vpack.c.bf16 %v1509_v43, %v1504_v42 }
 0x2fb   :  { %2530 = vmatprep.subr.bf16.mxu0 %v2529_v6  ;;  %v2457_v47 = vpack.c.bf16 %v1470_v59, %v1465_v56  ;;  %v1535_v56 = vld [vmem:[#allocation14 + $0x298] sm:$0xff]  ;;  %v1540_v59 = vld [vmem:[#allocation14 + $0x2c0] sm:$0xff]  ;;  %v1610_v42 = vld [vmem:[#allocation14 + $0x4f0] sm:$0xff] }
 0x2fc   :  { %2454 = vmatprep.subr.bf16.mxu1 %v2453_v45 }
 0x2fd   :  { %1392 = vmatmul.mubr.f32.gmra.mrb[10].mxu0 %v1297_v32  ;;  %v1454_v32 = vld [vmem:[#allocation14 + $0x10] sm:$0xff] }
 0x2fe   :  { %2532 = vmatpush3.bf16.msra.mxu0 %v2531_v62  ;;  %v2455_v61 = vpack.c.bf16 %v1459_v0, %v1454_v32  ;;  %v1464_v62 = vld [vmem:[#allocation14 + $0x60] sm:$0xff] }
 0x2ff   :  { %2534 = vmatprep.subr.bf16.mxu0 %v2533_v63  ;;  %v1475_v63 = vld [vmem:[#allocation14 + $0xb8] sm:$0xff]  ;;  %v2459_v8 = vpack.c.bf16 %v1469_v46, %v1464_v62  ;;  %v1524_v0 = vld [vmem:[#allocation14 + $0x240] sm:$0xff]  ;;  %v1550_v62 = vld [vmem:[#allocation14 + $0x310] sm:$0xff] }
 0x300   :  { %v2461_v11 = vpack.c.bf16 %v1480_v2, %v1475_v63  ;;  %v1549_v63 = vld [vmem:[#allocation14 + $0x308] sm:$0xff]  ;;  %v1555_v2 = vld [vmem:[#allocation14 + $0x338] sm:$0xff] }
 0x302   :  { %2536 = vmatpush3.bf16.msra.mxu0 %v2535_v4 }
 0x303   :  { %2538 = vmatprep.subr.bf16.mxu0 %v2537_v17 }
 0x306   :  { %2540 = vmatpush3.bf16.msra.mxu0 %v2539_v18 }
 0x307   :  { %2542 = vmatprep.subr.bf16.mxu0 %v2541_v33  ;;  %v1500_v33 = vld [vmem:[#allocation14 + $0x180] sm:$0xff] }
 0x308   :  { %v2469_v37 = vpack.c.bf16 %v1500_v33, %v1495_v31  ;;  %v1590_v31 = vld [vmem:[#allocation14 + $0x450] sm:$0xff]  ;;  %v2503_v33 = vpack.c.bf16 %v1579_v28, %v1574_v26 }
 0x30a   :  { %2544 = vmatpush3.bf16.msra.mxu0 %v2543_v35 }
 0x30b   :  { %2546 = vmatprep.subr.bf16.mxu0 %v2545_v44  ;;  %v1515_v44 = vld [vmem:[#allocation14 + $0x1f8] sm:$0xff] }
 0x30e   :  { %2548 = vmatpush3.bf16.msra.mxu0 %v2547_v21  ;;  %v1520_v21 = vld [vmem:[#allocation14 + $0x220] sm:$0xff] }
 0x30f   :  { %v2477_v45 = vpack.c.bf16 %v1520_v21, %v1515_v44  ;;  %v1604_v21 = vld [vmem:[#allocation14 + $0x4c0] sm:$0xff] }
 0x3c4   :  { %v1375_v49 = vpop.f32.mrb[4].mxu0 }
 0x3c5   :  { %v1418_v50 = vadd.f32 %v1411_v58, %v1375_v49  ;;  %v1377_v52 = vpop.f32.mrb[5].mxu0  ;;  %v1525_v49 = vld [vmem:[#allocation14 + $0x248] sm:$0xff] }
 0x3c6   :  { %v1419_v55 = vadd.f32 %v1415_v24, %v1377_v52 }
 0x3c7   :  { %v2981_v6 = vmax.f32 %v1418_v50, 0.0  ;;  %v1530_v50 = vld [vmem:[#allocation14 + $0x270] sm:$0xff] }
 0x3c8   :  { %v2983_v57 = vmax.f32 %v1419_v55, 0.0  ;;  %v1381_v60 = vpop.f32.mrb[6].mxu0  ;;  %v2481_v32 = vpack.c.bf16 %v1530_v50, %v1525_v49  ;;  %v1529_v55 = vld [vmem:[#allocation14 + $0x268] sm:$0xff] }
 0x3c9   :  { %v1420_v51 = vadd.f32 %v1411_v58, %v1381_v60  ;;  %v1383_v54 = vpop.f32.mrb[7].mxu0  ;;  %v2483_v60 = vpack.c.bf16 %v1529_v55, %v1524_v0 }
 0x3ca   :  { %v1421_v20 = vadd.f32 %v1415_v24, %v1383_v54  ;;  %1676 = vmatprep.mubr.f32.mxu1 %v2983_v57  ;;  %1846 = vmatprep.mubr.f32.mxu0 %v2983_v57  ;;  %v1539_v54 = vld [vmem:[#allocation14 + $0x2b8] sm:$0xff] }
 0x3cb   :  { %v2987_v3 = vmax.f32 %v1420_v51, 0.0  ;;  %1677 = vmatmul.mubr.f32.vlgmr.msra.gmra.mrb[12].mxu1 %v2981_v6  ;;  %1847 = vmatmul.mubr.f32.vlgmr.msra.gmra.mrb[12].mxu0 %v2981_v6  ;;  %v1534_v51 = vld [vmem:[#allocation14 + $0x290] sm:$0xff] }
 0x3cc   :  { %v2991_v4 = vmax.f32 %v1421_v20, 0.0  ;;  %v1387_v5 = vpop.f32.mrb[8].mxu0  ;;  %2456 = vmatpush1.bf16.msra.mxu1 %v2455_v61  ;;  %v2485_v61 = vpack.c.bf16 %v1540_v59, %v1535_v56  ;;  %v2487_v46 = vpack.c.bf16 %v1539_v54, %v1534_v51  ;;  %v1544_v20 = vld [vmem:[#allocation14 + $0x2e0] sm:$0xff] }
 0x3cd   :  { %v1422_v9 = vadd.f32 %v1411_v58, %v1387_v5  ;;  %v1389_v10 = vpop.f32.mrb[9].mxu0  ;;  %2458 = vmatprep.subr.bf16.mxu1 %v2457_v47  ;;  %v1545_v47 = vld [vmem:[#allocation14 + $0x2e8] sm:$0xff]  ;;  %v1560_v5 = vld [vmem:[#allocation14 + $0x360] sm:$0xff] }
 0x3ce   :  { %v1423_v14 = vadd.f32 %v1415_v24, %v1389_v10  ;;  %1682 = vmatprep.mubr.f32.mxu1 %v2991_v4  ;;  %1850 = vmatprep.mubr.f32.mxu0 %v2991_v4  ;;  %v1554_v10 = vld [vmem:[#allocation14 + $0x330] sm:$0xff] }
 0x3cf   :  { %v2995_v17 = vmax.f32 %v1422_v9, 0.0  ;;  %1683 = vmatmul.mubr.f32.gmra.mrb[14].mxu1 %v2987_v3  ;;  %1851 = vmatmul.mubr.f32.gmra.mrb[14].mxu0 %v2987_v3  ;;  %v2493_v9 = vpack.c.bf16 %v1560_v5, %v1555_v2 }
 0x3d0   :  { %v2999_v18 = vmax.f32 %v1423_v14, 0.0  ;;  %v1393_v19 = vpop.f32.mrb[10].mxu0  ;;  %2460 = vmatpush1.bf16.msra.mxu1 %v2459_v8  ;;  %v2491_v8 = vpack.c.bf16 %v1549_v63, %v1544_v20 }
 0x3d1   :  { %v1424_v23 = vadd.f32 %v1411_v58, %v1393_v19  ;;  %v1395_v7 = vpop.f32.mrb[11].mxu0  ;;  %2462 = vmatprep.subr.bf16.mxu1 %v2461_v11  ;;  %v1519_v58 = vld [vmem:[#allocation14 + $0x218] sm:$0xff]  ;;  %v1569_v19 = vld [vmem:[#allocation14 + $0x3a8] sm:$0xff] }
 0x3d2   :  { %v1425_v29 = vadd.f32 %v1415_v24, %v1395_v7  ;;  %1686 = vmatprep.mubr.f32.mxu1 %v2999_v18  ;;  %1855 = vmatprep.mubr.f32.mxu0 %v2999_v18  ;;  %v2479_v52 = vpack.c.bf16 %v1519_v58, %v1514_v48  ;;  %v1559_v11 = vld [vmem:[#allocation14 + $0x358] sm:$0xff]  ;;  %v2499_v7 = vpack.c.bf16 %v1569_v19, %v1564_v16 }
 0x3d3   :  { %v1432_v34 = vmax.f32 %v1424_v23, 0.0  ;;  %1687 = vmatmul.mubr.f32.gmra.mrb[16].mxu1 %v2995_v17  ;;  %1856 = vmatmul.mubr.f32.gmra.mrb[16].mxu0 %v2995_v17  ;;  %v2495_v14 = vpack.c.bf16 %v1559_v11, %v1554_v10  ;;  %v1580_v23 = vld [vmem:[#allocation14 + $0x400] sm:$0xff] }
 0x3d4   :  { %v1433_v35 = vmax.f32 %v1425_v29, 0.0  ;;  %2464 = vmatpush1.bf16.msra.mxu1 %v2463_v22  ;;  %v1575_v22 = vld [vmem:[#allocation14 + $0x3d8] sm:$0xff]  ;;  %v1585_v29 = vld [vmem:[#allocation14 + $0x428] sm:$0xff] }
 0x3d5   :  { %1440 = vst [vmem:[#allocation4 + $0x30] sm:$0x3] %v1432_v34  ;;  %2466 = vmatprep.subr.bf16.mxu1 %v2465_v25  ;;  %v2501_v25 = vpack.c.bf16 %v1580_v23, %v1575_v22  ;;  %v2505_v34 = vpack.c.bf16 %v1590_v31, %v1585_v29 }
 0x3d6   :  { %1441 = vst [vmem:[#allocation4 + $0x38] sm:$0x3] %v1433_v35  ;;  %v1584_v35 = vld [vmem:[#allocation14 + $0x420] sm:$0xff] }
 0x3d8   :  { %2468 = vmatpush1.bf16.msra.mxu1 %v2467_v36  ;;  %v1589_v36 = vld [vmem:[#allocation14 + $0x448] sm:$0xff] }
 0x3d9   :  { %2470 = vmatprep.subr.bf16.mxu1 %v2469_v37  ;;  %v1595_v37 = vld [vmem:[#allocation14 + $0x478] sm:$0xff]  ;;  %v2507_v39 = vpack.c.bf16 %v1589_v36, %v1584_v35 }
 0x3da   :  { %v2509_v53 = vpack.c.bf16 %v1600_v38, %v1595_v37 }
 0x3dc   :  { %2472 = vmatpush1.bf16.msra.mxu1 %v2471_v40  ;;  %v3009_v24 = vld [vmem:[#allocation4 + $0x30] sm:$0xff] }
 0x3dd   :  { %v3005_v1 = vld [vmem:[#allocation4 + $0x38] sm:$0xff]  ;;  %2474 = vmatprep.subr.bf16.mxu1 %v2473_v41  ;;  %v1599_v40 = vld [vmem:[#allocation14 + $0x498] sm:$0xff] }
 0x3de   :  { %1692 = vmatprep.mubr.f32.mxu1 %v3005_v1  ;;  %1859 = vmatprep.mubr.f32.mxu0 %v3005_v1  ;;  %v1605_v41 = vld [vmem:[#allocation14 + $0x4c8] sm:$0xff]  ;;  %v2511_v43 = vpack.c.bf16 %v1599_v40, %v1594_v30 }
 0x3df   :  { %1693 = vmatmul.mubr.f32.gmra.mrb[18].mxu1 %v3009_v24  ;;  %1860 = vmatmul.mubr.f32.gmra.mrb[18].mxu0 %v3009_v24  ;;  %v2513_v44 = vpack.c.bf16 %v1610_v42, %v1605_v41 }
 0x3e0   :  { %1761 = vmatprep.mubr.f32.mxu1 %v2983_v57  ;;  %2476 = vmatpush1.bf16.msra.mxu1 %v2475_v27  ;;  %v2489_v57 = vpack.c.bf16 %v1550_v62, %v1545_v47  ;;  %v1609_v27 = vld [vmem:[#allocation14 + $0x4e8] sm:$0xff] }
 0x3e1   :  { %2478 = vmatprep.subr.bf16.mxu1 %v2477_v45  ;;  %v2515_v45 = vpack.c.bf16 %v1609_v27, %v1604_v21 }
 0x3e4   :  { %2480 = vmatpush1.bf16.msra.mxu1 %v2479_v52 }
 0x3e5   :  { %2482 = vmatprep.subr.bf16.mxu1 %v2481_v32 }
 0x3e8   :  { %2484 = vmatpush1.bf16.msra.mxu1 %v2483_v60 }
 0x3e9   :  { %2486 = vmatprep.subr.bf16.mxu1 %v2485_v61 }
 0x3ec   :  { %2488 = vmatpush1.bf16.msra.mxu1 %v2487_v46 }
 0x3ed   :  { %2490 = vmatprep.subr.bf16.mxu1 %v2489_v57 }
 0x3f0   :  { %2492 = vmatpush1.bf16.msra.mxu1 %v2491_v8 }
 0x3f1   :  { %2494 = vmatprep.subr.bf16.mxu1 %v2493_v9 }
 0x3f4   :  { %2496 = vmatpush1.bf16.msra.mxu1 %v2495_v14 }
 0x3f5   :  { %2498 = vmatprep.subr.bf16.mxu1 %v2497_v15 }
 0x3f8   :  { %2500 = vmatpush1.bf16.msra.mxu1 %v2499_v7 }
 0x3f9   :  { %2502 = vmatprep.subr.bf16.mxu1 %v2501_v25 }
 0x3fc   :  { %2504 = vmatpush1.bf16.msra.mxu1 %v2503_v33 }
 0x3fd   :  { %2506 = vmatprep.subr.bf16.mxu1 %v2505_v34 }
 0x400   :  { %2508 = vmatpush1.bf16.msra.mxu1 %v2507_v39 }
 0x401   :  { %2510 = vmatprep.subr.bf16.mxu1 %v2509_v53 }
 0x404   :  { %2512 = vmatpush1.bf16.msra.mxu1 %v2511_v43 }
 0x405   :  { %2514 = vmatprep.subr.bf16.mxu1 %v2513_v44 }
 0x408   :  { %2516 = vmatpush1.bf16.msra.mxu1 %v2515_v45 }
 0x40b   :  { %1762 = vmatmul.mubr.f32.vlgmr.msra.gmra.mrb[20].mxu1 %v2981_v6 }
 0x40c   :  { %1767 = vmatprep.mubr.f32.mxu1 %v2991_v4 }
 0x40f   :  { %1768 = vmatmul.mubr.f32.gmra.mrb[22].mxu1 %v2987_v3 }
 0x410   :  { %1771 = vmatprep.mubr.f32.mxu1 %v2999_v18 }
 0x413   :  { %1772 = vmatmul.mubr.f32.gmra.mrb[24].mxu1 %v2995_v17 }
 0x414   :  { %1777 = vmatprep.mubr.f32.mxu1 %v3005_v1 }
 0x417   :  { %1778 = vmatmul.mubr.f32.gmra.mrb[26].mxu1 %v3009_v24 }
 0x49e   :  { %v1678_v48 = vpop.f32.mrb[12].mxu1  ;;  %v2047_v58 = vpop.f32.mrb[12].mxu0 }
 0x49f   :  { %v1680_v49 = vpop.f32.mrb[13].mxu1  ;;  %v2048_v50 = vpop.f32.mrb[13].mxu0  ;;  %v1866_v52 = vrot.slane %v1678_v48, 1 }
 0x4a0   :  { %v1875_v32 = vrot.slane %v1680_v49, 3  ;;  %v1872_v16 = vrot.slane %v1680_v49, 2 }
 0x4a1   :  { %1867 = vrot.lane.b32.xlu0 %v1866_v52, %s2730_s6 }
 0x4a2   :  { %1876 = vrot.lane.b32.xlu1 %v1875_v32, %s2730_s6  ;;  %v1684_v6 = vpop.f32.mrb[14].mxu1  ;;  %v2050_v3 = vpop.f32.mrb[14].mxu0 }
 0x4a3   :  { %v1685_v4 = vpop.f32.mrb[15].mxu1  ;;  %v2051_v18 = vpop.f32.mrb[15].mxu0  ;;  %v1995_v6 = vld [vmem:[%s3051_s8] ss:$0 sm:$0xff] }
 0x4a4   :  { %v2052_v17 = vadd.f32 %v2051_v18, %v2050_v3  ;;  %v1996_v18 = vld [vmem:[%s3052_s9] ss:$0 sm:$0xff] }
 0x4a6   :  { %v1688_v0 = vpop.f32.mrb[16].mxu1  ;;  %v2053_v1 = vpop.f32.mrb[16].mxu0  ;;  %v1900_v8 = vrot.slane %v2052_v17, 1 }
 0x4a7   :  { %v1908_v55 = vrot.slane %v1688_v0, 1  ;;  %v1690_v24 = vpop.f32.mrb[17].mxu1  ;;  %v2054_v56 = vpop.f32.mrb[17].mxu0 }
 0x4a8   :  { %v1917_v59 = vrot.slane %v1690_v24, 3  ;;  %v1914_v29 = vrot.slane %v1690_v24, 2 }
 0x4a9   :  { %1909 = vrot.lane.b32.xlu0 %v1908_v55, %s2730_s6  ;;  %v1971_v55 = vstv %s3053_s10 }
 0x4aa   :  { %1918 = vrot.lane.b32.xlu1 %v1917_v59, %s2730_s6 }
 0x4b2   :  { %v1694_v60 = vpop.f32.mrb[18].mxu1  ;;  %v2056_v61 = vpop.f32.mrb[18].mxu0 }
 0x4b3   :  { %v1695_v51 = vpop.f32.mrb[19].mxu1  ;;  %v2057_v54 = vpop.f32.mrb[19].mxu0 }
 0x4b4   :  { %v2058_v47 = vadd.f32 %v2057_v54, %v2056_v61 }
 0x4b6   :  { %v1942_v14 = vrot.slane %v2058_v47, 1 }
 0x4de   :  { %v1763_v62 = vpop.f32.mrb[20].mxu1 }
 0x4df   :  { %v1884_v46 = vrot.slane %v1763_v62, 5  ;;  %v1765_v57 = vpop.f32.mrb[21].mxu1  ;;  %v1881_v7 = vrot.slane %v1763_v62, 4 }
 0x4e0   :  { %v1893_v63 = vrot.slane %v1765_v57, 7  ;;  %v1890_v39 = vrot.slane %v1765_v57, 6 }
 0x4e1   :  { %1885 = vrot.lane.b32.xlu0 %v1884_v46, %s2730_s6 }
 0x4e2   :  { %v1769_v20 = vpop.f32.mrb[22].mxu1 }
 0x4e3   :  { %v1770_v2 = vpop.f32.mrb[23].mxu1 }
 0x4e5   :  { %1894 = vrot.lane.b32.xlu0 %v1893_v63, %s2730_s6 }
 0x4e6   :  { %v1773_v5 = vpop.f32.mrb[24].mxu1 }
 0x4e7   :  { %v1926_v9 = vrot.slane %v1773_v5, 5  ;;  %v1775_v10 = vpop.f32.mrb[25].mxu1  ;;  %v1923_v35 = vrot.slane %v1773_v5, 4 }
 0x4e8   :  { %v1935_v12 = vrot.slane %v1775_v10, 7  ;;  %v1932_v21 = vrot.slane %v1775_v10, 6 }
 0x4e9   :  { %1901 = vrot.lane.b32.xlu0 %v1900_v8, %s2730_s6  ;;  %1927 = vrot.lane.b32.xlu1 %v1926_v9, %s2730_s6 }
 0x4ea   :  { %v1779_v11 = vpop.f32.mrb[26].mxu1 }
 0x4eb   :  { %v1780_v13 = vpop.f32.mrb[27].mxu1 }
 0x4ed   :  { %1936 = vrot.lane.b32.xlu1 %v1935_v12, %s2730_s6 }
 0x4f1   :  { %1943 = vrot.lane.b32.xlu1 %v1942_v14, %s2730_s6 }
 0x513   :  { %v1868_v15 = vpop.permute.xlu0 %1867 }
 0x514   :  { %v1870_v19 = vadd.f32 %v1868_v15, %v1678_v48  ;;  %v1877_v23 = vpop.permute.xlu1 %1876 }
 0x516   :  { %v1874_v22 = vadd.f32 %v1872_v16, %v1870_v19 }
 0x518   :  { %v1879_v25 = vadd.f32 %v1877_v23, %v1874_v22 }
 0x51a   :  { %v1883_v26 = vadd.f32 %v1881_v7, %v1879_v25 }
 0x51b   :  { %v1910_v28 = vpop.permute.xlu0 %1909 }
 0x51c   :  { %v1912_v31 = vadd.f32 %v1910_v28, %v1688_v0  ;;  %v1919_v34 = vpop.permute.xlu1 %1918 }
 0x51e   :  { %v1916_v33 = vadd.f32 %v1914_v29, %v1912_v31 }
 0x520   :  { %v1921_v36 = vadd.f32 %v1919_v34, %v1916_v33 }
 0x522   :  { %v1925_v37 = vadd.f32 %v1923_v35, %v1921_v36 }
 0x553   :  { %v1886_v38 = vpop.permute.xlu0 %1885 }
 0x554   :  { %v1888_v53 = vadd.f32 %v1886_v38, %v1883_v26 }
 0x556   :  { %v1892_v30 = vadd.f32 %v1890_v39, %v1888_v53 }
 0x557   :  { %v1895_v40 = vpop.permute.xlu0 %1894 }
 0x558   :  { %v1897_v41 = vadd.f32 %v1895_v40, %v1892_v30 }
 0x55a   :  { %v1898_v42 = vadd.f32 %v2052_v17, %v1897_v41 }
 0x55b   :  { %v1902_v43 = vpop.permute.xlu0 %1901  ;;  %v1928_v44 = vpop.permute.xlu1 %1927 }
 0x55c   :  { %v1904_v27 = vadd.f32 %v1902_v43, %v1898_v42  ;;  %v1930_v45 = vadd.f32 %v1928_v44, %v1925_v37 }
 0x55e   :  { %1906 = vst.msk [vmem:[#allocation5] sm:$0x1] %vm1905_vm3, %v1904_v27  ;;  %v1934_v48 = vadd.f32 %v1932_v21, %v1930_v45 }
 0x55f   :  { %v1937_v58 = vpop.permute.xlu1 %1936 }
 0x560   :  { %v1939_v49 = vadd.f32 %v1937_v58, %v1934_v48 }
 0x562   :  { %v1940_v50 = vadd.f32 %v2058_v47, %v1939_v49 }
 0x563   :  { %v1944_v52 = vpop.permute.xlu1 %1943 }
 0x564   :  { %v1946_v32 = vadd.f32 %v1944_v52, %v1940_v50 }
 0x566   :  { %1947 = vst.msk [vmem:[#allocation5 + $0x1] sm:$0x1] %vm1905_vm3, %v1946_v32 }
 0x56d   :  { %v1948_v3 = vld [vmem:[#allocation5] sm:$0x3] }
 0x56e   :  { %v1956_v4 = vadd.f32 %v1995_v6, %v1948_v3 }
 0x570   :  { %v1957_v17 = vmax.f32 %v1956_v4, 0.0 }
 0x572   :  { %v1965_v0 = vmul.f32 %v1996_v18, %v1957_v17 }
 0x574   :  { %v1967_v1 = vsel %vm1966_vm4, %v1965_v0, 0.0 }
 0x575   :  { %1968 = vadd.xlane.f32.xlu0 %v1967_v1 }
 0x602   :  { %v1969_v24 = vpop.xlane.xlu0 %1968 }
 0x603   :  { %v1972_v56 = vadd.f32 %v1971_v55, %v1969_v24 }
 0x605   :  { %1974 = vst.msk [vmem:[%s3054_s11] sm:$0x3] %vm1973_vm5, %v1972_v56 }
 0x606   :  { %1979 = vsyncpa [#allocation8], 1 }
 0x607   :  { %1980 = vsyncpa [#allocation10], 1 }
 0x608   :  { %1981 = vsyncpa [#allocation13], 1 }

</bundles_post_ra>
